<compile_context>
chip_gen: v5e
topology: v5e:2x2
jax: 0.10.0
libtpu: 0.0.40
codegen_flags: <defaults>
</compile_context>

<pallas_src>
import functools

import jax
import jax.numpy as jnp
from jax import lax
from jax.experimental import pallas as pl
from jax.experimental.pallas import tpu as pltpu


def _round_up(x, m):
    return (x + m - 1) // m * m


def gru_chunk_kernel(ids_ref, gi_ref, whh_ref, bhn_ref, lens_ref,
                     out_ref, hfin_ref, h_scr):
    """One grid step == one (batch_tile, time_chunk) tile of the GRU recurrence.

    ids_ref : (Tc, Bt, 1) int32   token ids, time-major
    gi_ref  : (Vp, 3Hp) f32       emb @ W_ih^T + b_ih (+ b_hr/b_hz folded), resident
    whh_ref : (Hp, 3Hp) bf16      W_hh^T, zero-padded per gate, resident
    bhn_ref : (1, Hp)   f32       b_hn only (must stay inside r*(...))
    lens_ref: (Bt, 1)   int32     sequence lengths (0 for padded batch rows)
    out_ref : (Tc, Bt, Hp) f32    outputs (zero for t >= length[b])
    hfin_ref: (1, Bt, Hp)  f32    final hidden (resident, written every chunk)
    h_scr   : (Bt, Hp)     f32    carried hidden state (VMEM scratch)
    """
    c = pl.program_id(1)                    # time-chunk index (inner, sequential)
    t_chunk = out_ref.shape[0]
    bt = h_scr.shape[0]
    hp = h_scr.shape[-1]
    vp = gi_ref.shape[0]

    @pl.when(c == 0)
    def _():
        h_scr[...] = jnp.zeros_like(h_scr)

    # Loop invariants, hoisted out of the time loop (incl. the iota broadcast).
    gi_tab = gi_ref[...]                    # (Vp, 3Hp) f32, biases folded in
    whh = whh_ref[...]                      # (Hp, 3Hp) bf16
    whh_rz = whh[:, :2 * hp]                # (Hp, 2Hp)
    whh_n = whh[:, 2 * hp:]                 # (Hp, Hp)
    bhn = bhn_ref[...]                      # (1, Hp)
    lens = lens_ref[...]                    # (Bt, 1) int32
    vocab_iota = lax.broadcasted_iota(jnp.int32, (bt, vp), 1)
    t0 = c * t_chunk

    def step(t, h):
        # --- In-kernel embedding + input-projection gather (exact one-hot matmul,
        #     independent of h -> overlaps with the recurrence matmuls).
        idx = ids_ref[t]                                        # (Bt, 1) int32
        onehot = (idx == vocab_iota).astype(jnp.float32)        # (Bt, Vp)
        gi = jnp.dot(onehot, gi_tab,
                     preferred_element_type=jnp.float32)        # (Bt, 3Hp)

        # --- Hidden projection, gate-split, bf16 operands / f32 accumulation.
        hb = h.astype(jnp.bfloat16)
        gh_rz = jnp.dot(hb, whh_rz, preferred_element_type=jnp.float32)
        r = jax.nn.sigmoid(gi[:, :hp] + gh_rz[:, :hp])
        z = jax.nn.sigmoid(gi[:, hp:2 * hp] + gh_rz[:, hp:])
        gh_n = jnp.dot(hb, whh_n, preferred_element_type=jnp.float32)
        n = jnp.tanh(gi[:, 2 * hp:] + r * (gh_n + bhn))
        h_new = n + z * (h - n)             # == (1 - z) * n + z * h

        # Packed-sequence semantics: t >= length[b] freezes h and emits zeros.
        valid = lens > (t0 + t)             # (Bt, 1) bool
        h = jnp.where(valid, h_new, h)
        out_ref[t] = jnp.where(valid, h_new, 0.0)
        return h

    h = lax.fori_loop(0, t_chunk, step, h_scr[...], unroll=min(8, t_chunk))
    h_scr[...] = h
    hfin_ref[0] = h                         # resident block; last chunk's write wins


@functools.partial(jax.jit, static_argnames=("batch_first",))
def encoder_forward(input_ids, lengths, emb_table, w_ih, w_hh, b_ih, b_hh,
                    batch_first=True):
    """Equivalent of Encoder.forward(input, lengths).

    Returns:
      outputs: (B, T, H) padded GRU outputs (time-major (T, B, H) if
               batch_first=False, which skips the post-kernel transpose)
      hiddens: (1, B, H) final hidden state
    """
    B, T = input_ids.shape
    V, H = emb_table.shape

    Hp = _round_up(H, 128)                  # lane-dense hidden
    Vp = _round_up(V, 8)                    # sublane-dense vocab table
    Bp = _round_up(B, 8)                    # sublane-dense batch
    b_tile = min(Bp, 128)                   # 128-row batch tiles -> MXU-friendly,
    Bp = _round_up(Bp, b_tile)              # and >1 tile spans both v7x TCs
    num_b_tiles = Bp // b_tile
    Tc = min(_round_up(T, 8), 256)          # time steps per grid step
    Tp = _round_up(T, Tc)
    num_chunks = Tp // Tc
    G3 = 3 * Hp

    f32 = jnp.float32
    # --- Fold embedding + input projection (embedding is frozen) and the r/z
    #     halves of b_hh:  gi_table[v] = emb[v] @ W_ih^T + b_ih (+ b_hr, b_hz).
    gi_table = emb_table.astype(f32) @ w_ih.T.astype(f32) + b_ih     # (V, 3H)
    gi_table = gi_table.at[:, :2 * H].add(b_hh[:2 * H])
    whh_t = w_hh.T                                                   # (H, 3H)

    # Gate-padded layouts; padded rows/lanes are zero so padded hidden lanes stay 0.
    gi_pad = jnp.zeros((Vp, G3), f32)
    whh_pad = jnp.zeros((Hp, G3), f32)
    bhn_pad = jnp.zeros((1, Hp), f32)
    for g in range(3):
        gi_pad = gi_pad.at[:V, g * Hp:g * Hp + H].set(gi_table[:, g * H:(g + 1) * H])
        whh_pad = whh_pad.at[:H, g * Hp:g * Hp + H].set(whh_t[:, g * H:(g + 1) * H])
    bhn_pad = bhn_pad.at[0, :H].set(b_hh[2 * H:3 * H])
    whh_pad = whh_pad.astype(jnp.bfloat16)          # bf16 MXU operand (f32 accum)

    # Only the tiny int32 id stream goes to HBM (time-major), not activations.
    ids_tm = jnp.zeros((Tp, Bp, 1), jnp.int32).at[:T, :B, 0].set(
        input_ids.astype(jnp.int32).T)
    lens_col = jnp.zeros((Bp, 1), jnp.int32).at[:B, 0].set(lengths.astype(jnp.int32))

    # Explicit VMEM budget (double-buffered streamed blocks + resident tables).
    blk_bytes = (2 * Tc * b_tile * 4                 # ids
                 + 2 * Tc * b_tile * Hp * 4          # outputs
                 + 2 * b_tile * Hp * 4               # final hidden
                 + 2 * Vp * G3 * 4                   # gi table
                 + 2 * Hp * G3 * 2                   # W_hh^T (bf16)
                 + 2 * Hp * 4 + 2 * b_tile * 4       # b_hn, lens
                 + b_tile * Hp * 4)                  # h scratch
    vmem_limit = int(min(64 * 1024 * 1024, max(4 * 1024 * 1024, 2 * blk_bytes)))
    # TODO(synk): for very large Hp on v7x, single-buffer the resident inputs
    # (pipeline_mode=pl.Buffered(1)) to halve their VMEM footprint.

    out_tm, h_fin = pl.pallas_call(
        gru_chunk_kernel,
        out_shape=(jax.ShapeDtypeStruct((Tp, Bp, Hp), f32),
                   jax.ShapeDtypeStruct((1, Bp, Hp), f32)),
        grid_spec=pltpu.PrefetchScalarGridSpec(
            num_scalar_prefetch=0,
            grid=(num_b_tiles, num_chunks),               # time is the inner axis
            in_specs=[
                pl.BlockSpec((Tc, b_tile, 1), lambda b, c: (c, b, 0)),   # token ids
                pl.BlockSpec((Vp, G3), lambda b, c: (0, 0)),             # gi table
                pl.BlockSpec((Hp, G3), lambda b, c: (0, 0)),             # W_hh^T
                pl.BlockSpec((1, Hp), lambda b, c: (0, 0)),              # b_hn
                pl.BlockSpec((b_tile, 1), lambda b, c: (b, 0)),          # lengths
            ],
            out_specs=[
                pl.BlockSpec((Tc, b_tile, Hp), lambda b, c: (c, b, 0)),  # outputs
                pl.BlockSpec((1, b_tile, Hp), lambda b, c: (0, b, 0)),   # final hidden
            ],
            scratch_shapes=[pltpu.VMEM((b_tile, Hp), f32)],              # carried h
        ),
        compiler_params=pltpu.CompilerParams(
            dimension_semantics=("parallel", "arbitrary"),  # batch ∥, time sequential
            vmem_limit_bytes=vmem_limit),
    )(ids_tm, gi_pad, whh_pad, bhn_pad, lens_col)

    hiddens = h_fin[:, :B, :H]                              # (1, B, H)
    out_tm = out_tm[:T, :B, :H]                             # (T, B, H)
    if batch_first:
        return jnp.transpose(out_tm, (1, 0, 2)), hiddens    # (B, T, H)
    return out_tm, hiddens                                  # time-major, no transpose


def reference_forward(input_ids, lengths, emb_table, w_ih, w_hh, b_ih, b_hh):
    """Pure-JAX f32 reference (same packed-GRU semantics) for a sanity check."""
    B, T = input_ids.shape
    H = emb_table.shape[1]
    x = emb_table[input_ids]                     # (B, T, H)
    h = jnp.zeros((B, H), jnp.float32)
    outs = []
    for t in range(T):
        xt = x[:, t, :]
        gi = xt @ w_ih.T + b_ih
        gh = h @ w_hh.T + b_hh
        i_r, i_z, i_n = gi[:, :H], gi[:, H:2 * H], gi[:, 2 * H:]
        h_r, h_z, h_n = gh[:, :H], gh[:, H:2 * H], gh[:, 2 * H:]
        r = jax.nn.sigmoid(i_r + h_r)
        z = jax.nn.sigmoid(i_z + h_z)
        n = jnp.tanh(i_n + r * h_n)
        h_new = (1.0 - z) * n + z * h
        valid = (lengths > t).astype(jnp.float32)[:, None]
        h = valid * h_new + (1.0 - valid) * h
        outs.append(valid * h_new)
    return jnp.stack(outs, axis=1), h[None]


if __name__ == "__main__":
    # Small shapes consistent with the module: vocab (input_size)=16, hidden=32,
    # batch=2, seq=8. Lengths must be sorted descending (pack_padded_sequence).
    VOCAB, H, B, T = 16, 32, 2, 8

    key = jax.random.PRNGKey(0)
    k_emb, k_ih, k_hh, k_bih, k_bhh, k_tok = jax.random.split(key, 6)

    # Deterministic "embs" (the numpy array copied into the frozen nn.Embedding).
    emb_table = jax.random.normal(k_emb, (VOCAB, H), jnp.float32)

    # nn.GRU parameters (PyTorch shapes: weight_ih_l0 (3H,H), weight_hh_l0 (3H,H)).
    scale = 1.0 / jnp.sqrt(jnp.float32(H))
    w_ih = jax.random.uniform(k_ih, (3 * H, H), jnp.float32, -scale, scale)
    w_hh = jax.random.uniform(k_hh, (3 * H, H), jnp.float32, -scale, scale)
    b_ih = jax.random.uniform(k_bih, (3 * H,), jnp.float32, -scale, scale)
    b_hh = jax.random.uniform(k_bhh, (3 * H,), jnp.float32, -scale, scale)

    input_ids = jax.random.randint(k_tok, (B, T), 0, VOCAB, jnp.int32)
    lengths = jnp.array([8, 5], jnp.int32)       # sorted descending

    outputs, hiddens = encoder_forward(
        input_ids, lengths, emb_table, w_ih, w_hh, b_ih, b_hh)
    jax.block_until_ready((outputs, hiddens))

    ref_out, ref_h = reference_forward(
        input_ids, lengths, emb_table, w_ih, w_hh, b_ih, b_hh)
    # bf16 W_hh^T / h operands on the MXU (f32 accumulation) -> ~1e-2-level drift
    # vs the pure-f32 reference is expected and accepted.
    assert jnp.allclose(outputs, ref_out, atol=3e-2, rtol=3e-2)
    assert jnp.allclose(hiddens, ref_h, atol=3e-2, rtol=3e-2)

    print("KERNEL_OK")
</pallas_src>

<mosaic_0001>
module attributes {stable_mosaic.version = 11 : i64} {
  func.func @gru_chunk_kernel(%arg0: i32, %arg1: i32, %arg2: memref<8x8x1xi32, #tpu.memory_space<vmem>>, %arg3: memref<16x384xf32, #tpu.memory_space<vmem>>, %arg4: memref<128x384xbf16, #tpu.memory_space<vmem>>, %arg5: memref<1x128xf32, #tpu.memory_space<vmem>>, %arg6: memref<8x1xi32, #tpu.memory_space<vmem>>, %arg7: memref<8x8x128xf32, #tpu.memory_space<vmem>>, %arg8: memref<1x8x128xf32, #tpu.memory_space<vmem>>, %arg9: memref<8x128xf32, #tpu.memory_space<vmem>>) attributes {dimension_semantics = [#tpu.dimension_semantics<parallel>, #tpu.dimension_semantics<arbitrary>], iteration_bounds = array<i64: 1, 1>, scalar_prefetch = 0 : i64, scratch_operands = 1 : i64, tpu.core_type = #tpu.core_type<tc>, window_params = [{transform_indices = @transform_0, window_bounds = array<i64: 8, 8, 1>}, {pipeline_mode = #tpu.pipeline_mode<synchronous>, transform_indices = @transform_1, window_bounds = array<i64: 16, 384>}, {pipeline_mode = #tpu.pipeline_mode<synchronous>, transform_indices = @transform_2, window_bounds = array<i64: 128, 384>}, {pipeline_mode = #tpu.pipeline_mode<synchronous>, transform_indices = @transform_3, window_bounds = array<i64: 1, 128>}, {transform_indices = @transform_4, window_bounds = array<i64: 8, 1>}, {transform_indices = @transform_5, window_bounds = array<i64: 8, 8, 128>}, {transform_indices = @transform_6, window_bounds = array<i64: 1, 8, 128>}]} {
    %c0_i32 = arith.constant 0 : i32
    %0 = arith.cmpi eq, %arg1, %c0_i32 : i32
    %1 = arith.extui %0 : i1 to i32
    %c0_i32_0 = arith.constant 0 : i32
    %2 = arith.cmpi ne, %1, %c0_i32_0 : i32
    scf.if %2 {
      %cst_96 = arith.constant 0.000000e+00 : f32
      %416 = vector.broadcast %cst_96 : f32 to vector<8x128xf32>
      %c0_97 = arith.constant 0 : index
      %c0_98 = arith.constant 0 : index
      %417 = vector.load %arg9[%c0_97, %c0_98] : memref<8x128xf32, #tpu.memory_space<vmem>>, vector<8x128xf32>
      tpu.vector_store %arg9[%c0_97, %c0_98], %416 {strides = array<i32>} : memref<8x128xf32, #tpu.memory_space<vmem>>, vector<8x128xf32>,
    } else {
    }
    %c0 = arith.constant 0 : index
    %c0_1 = arith.constant 0 : index
    %3 = vector.load %arg3[%c0, %c0_1] : memref<16x384xf32, #tpu.memory_space<vmem>>, vector<16x384xf32>
    %c0_2 = arith.constant 0 : index
    %c0_3 = arith.constant 0 : index
    %4 = vector.load %arg4[%c0_2, %c0_3] : memref<128x384xbf16, #tpu.memory_space<vmem>>, vector<128x384xbf16>
    %5 = vector.extract_strided_slice %4 {offsets = [0, 0], sizes = [128, 256], strides = [1, 1]} : vector<128x384xbf16> to vector<128x256xbf16>
    %6 = vector.extract_strided_slice %4 {offsets = [0, 256], sizes = [128, 128], strides = [1, 1]} : vector<128x384xbf16> to vector<128x128xbf16>
    %c0_4 = arith.constant 0 : index
    %c0_5 = arith.constant 0 : index
    %7 = vector.load %arg5[%c0_4, %c0_5] : memref<1x128xf32, #tpu.memory_space<vmem>>, vector<1x128xf32>
    %c0_6 = arith.constant 0 : index
    %c0_7 = arith.constant 0 : index
    %8 = vector.load %arg6[%c0_6, %c0_7] : memref<8x1xi32, #tpu.memory_space<vmem>>, vector<8x1xi32>
    %9 = tpu.iota {dimensions = array<i32: 1>} : vector<8x16xi32>
    %c8_i32 = arith.constant 8 : i32
    %10 = arith.muli %arg1, %c8_i32 : i32
    %c0_8 = arith.constant 0 : index
    %c0_9 = arith.constant 0 : index
    %11 = vector.load %arg9[%c0_8, %c0_9] : memref<8x128xf32, #tpu.memory_space<vmem>>, vector<8x128xf32>
    %c0_i32_10 = arith.constant 0 : i32
    %12 = arith.index_cast %c0_i32_10 : i32 to index
    %c0_11 = arith.constant 0 : index
    %c0_12 = arith.constant 0 : index
    %13 = vector.load %arg2[%12, %c0_11, %c0_12] : memref<8x8x1xi32, #tpu.memory_space<vmem>>, vector<1x8x1xi32>
    %14 = vector.shape_cast %13 : vector<1x8x1xi32> to vector<8x1xi32>
    %15 = vector.broadcast %14 : vector<8x1xi32> to vector<8x16xi32>
    %16 = arith.cmpi eq, %15, %9 : vector<8x16xi32>
    %17 = arith.extui %16 : vector<8x16xi1> to vector<8x16xi32>
    %18 = arith.sitofp %17 : vector<8x16xi32> to vector<8x16xf32>
    %cst = arith.constant dense<0.000000e+00> : vector<8x384xf32>
    %19 = tpu.matmul %18, %3, %cst {dimension_numbers = #tpu.dot_dimension_numbers<[1], [0], [0], [1], [0, 0, 1, 1], [], []>} : vector<8x16xf32>, vector<16x384xf32>, vector<8x384xf32> -> vector<8x384xf32>
    %20 = arith.truncf %11 : vector<8x128xf32> to vector<8x128xbf16>
    %cst_13 = arith.constant dense<0.000000e+00> : vector<8x256xf32>
    %21 = tpu.matmul %20, %5, %cst_13 {dimension_numbers = #tpu.dot_dimension_numbers<[1], [0], [0], [1], [0, 0, 1, 1], [], []>} : vector<8x128xbf16>, vector<128x256xbf16>, vector<8x256xf32> -> vector<8x256xf32>
    %22 = vector.extract_strided_slice %19 {offsets = [0, 0], sizes = [8, 128], strides = [1, 1]} : vector<8x384xf32> to vector<8x128xf32>
    %23 = vector.extract_strided_slice %21 {offsets = [0, 0], sizes = [8, 128], strides = [1, 1]} : vector<8x256xf32> to vector<8x128xf32>
    %24 = arith.addf %22, %23 : vector<8x128xf32>
    %25 = arith.negf %24 : vector<8x128xf32>
    %26 = math.exp %25 : vector<8x128xf32>
    %cst_14 = arith.constant 1.000000e+00 : f32
    %27 = vector.broadcast %cst_14 : f32 to vector<8x128xf32>
    %28 = arith.addf %27, %26 : vector<8x128xf32>
    %29 = arith.divf %27, %28 : vector<8x128xf32>
    %30 = vector.extract_strided_slice %19 {offsets = [0, 128], sizes = [8, 128], strides = [1, 1]} : vector<8x384xf32> to vector<8x128xf32>
    %31 = vector.extract_strided_slice %21 {offsets = [0, 128], sizes = [8, 128], strides = [1, 1]} : vector<8x256xf32> to vector<8x128xf32>
    %32 = arith.addf %30, %31 : vector<8x128xf32>
    %33 = arith.negf %32 : vector<8x128xf32>
    %34 = math.exp %33 : vector<8x128xf32>
    %cst_15 = arith.constant 1.000000e+00 : f32
    %35 = vector.broadcast %cst_15 : f32 to vector<8x128xf32>
    %36 = arith.addf %35, %34 : vector<8x128xf32>
    %37 = arith.divf %35, %36 : vector<8x128xf32>
    %cst_16 = arith.constant dense<0.000000e+00> : vector<8x128xf32>
    %38 = tpu.matmul %20, %6, %cst_16 {dimension_numbers = #tpu.dot_dimension_numbers<[1], [0], [0], [1], [0, 0, 1, 1], [], []>} : vector<8x128xbf16>, vector<128x128xbf16>, vector<8x128xf32> -> vector<8x128xf32>
    %39 = vector.extract_strided_slice %19 {offsets = [0, 256], sizes = [8, 128], strides = [1, 1]} : vector<8x384xf32> to vector<8x128xf32>
    %40 = vector.broadcast %7 : vector<1x128xf32> to vector<8x128xf32>
    %41 = arith.addf %38, %40 : vector<8x128xf32>
    %42 = arith.mulf %29, %41 : vector<8x128xf32>
    %43 = arith.addf %39, %42 : vector<8x128xf32>
    %44 = math.tanh %43 : vector<8x128xf32>
    %45 = arith.subf %11, %44 : vector<8x128xf32>
    %46 = arith.mulf %37, %45 : vector<8x128xf32>
    %47 = arith.addf %44, %46 : vector<8x128xf32>
    %48 = arith.addi %10, %c0_i32_10 : i32
    %49 = vector.broadcast %48 : i32 to vector<8x1xi32>
    %50 = arith.cmpi sgt, %8, %49 : vector<8x1xi32>
    %51 = vector.shape_cast %50 : vector<8x1xi1> to vector<8x1xi1>
    %52 = vector.broadcast %51 : vector<8x1xi1> to vector<8x128xi1>
    %53 = arith.select %52, %47, %11 : vector<8x128xi1>, vector<8x128xf32>
    %cst_17 = arith.constant 0.000000e+00 : f32
    %54 = vector.shape_cast %50 : vector<8x1xi1> to vector<8x1xi1>
    %55 = vector.broadcast %54 : vector<8x1xi1> to vector<8x128xi1>
    %56 = vector.broadcast %cst_17 : f32 to vector<8x128xf32>
    %57 = arith.select %55, %47, %56 : vector<8x128xi1>, vector<8x128xf32>
    %58 = arith.index_cast %c0_i32_10 : i32 to index
    %c0_18 = arith.constant 0 : index
    %c0_19 = arith.constant 0 : index
    %59 = vector.load %arg7[%58, %c0_18, %c0_19] : memref<8x8x128xf32, #tpu.memory_space<vmem>>, vector<1x8x128xf32>
    %60 = vector.shape_cast %59 : vector<1x8x128xf32> to vector<8x128xf32>
    %61 = vector.shape_cast %57 : vector<8x128xf32> to vector<1x8x128xf32>
    tpu.vector_store %arg7[%58, %c0_18, %c0_19], %61 {strides = array<i32>} : memref<8x8x128xf32, #tpu.memory_space<vmem>>, vector<1x8x128xf32>,
    %c1_i32 = arith.constant 1 : i32
    %62 = arith.index_cast %c1_i32 : i32 to index
    %c0_20 = arith.constant 0 : index
    %c0_21 = arith.constant 0 : index
    %63 = vector.load %arg2[%62, %c0_20, %c0_21] : memref<8x8x1xi32, #tpu.memory_space<vmem>>, vector<1x8x1xi32>
    %64 = vector.shape_cast %63 : vector<1x8x1xi32> to vector<8x1xi32>
    %65 = vector.broadcast %64 : vector<8x1xi32> to vector<8x16xi32>
    %66 = arith.cmpi eq, %65, %9 : vector<8x16xi32>
    %67 = arith.extui %66 : vector<8x16xi1> to vector<8x16xi32>
    %68 = arith.sitofp %67 : vector<8x16xi32> to vector<8x16xf32>
    %cst_22 = arith.constant dense<0.000000e+00> : vector<8x384xf32>
    %69 = tpu.matmul %68, %3, %cst_22 {dimension_numbers = #tpu.dot_dimension_numbers<[1], [0], [0], [1], [0, 0, 1, 1], [], []>} : vector<8x16xf32>, vector<16x384xf32>, vector<8x384xf32> -> vector<8x384xf32>
    %70 = arith.truncf %53 : vector<8x128xf32> to vector<8x128xbf16>
    %cst_23 = arith.constant dense<0.000000e+00> : vector<8x256xf32>
    %71 = tpu.matmul %70, %5, %cst_23 {dimension_numbers = #tpu.dot_dimension_numbers<[1], [0], [0], [1], [0, 0, 1, 1], [], []>} : vector<8x128xbf16>, vector<128x256xbf16>, vector<8x256xf32> -> vector<8x256xf32>
    %72 = vector.extract_strided_slice %69 {offsets = [0, 0], sizes = [8, 128], strides = [1, 1]} : vector<8x384xf32> to vector<8x128xf32>
    %73 = vector.extract_strided_slice %71 {offsets = [0, 0], sizes = [8, 128], strides = [1, 1]} : vector<8x256xf32> to vector<8x128xf32>
    %74 = arith.addf %72, %73 : vector<8x128xf32>
    %75 = arith.negf %74 : vector<8x128xf32>
    %76 = math.exp %75 : vector<8x128xf32>
    %cst_24 = arith.constant 1.000000e+00 : f32
    %77 = vector.broadcast %cst_24 : f32 to vector<8x128xf32>
    %78 = arith.addf %77, %76 : vector<8x128xf32>
    %79 = arith.divf %77, %78 : vector<8x128xf32>
    %80 = vector.extract_strided_slice %69 {offsets = [0, 128], sizes = [8, 128], strides = [1, 1]} : vector<8x384xf32> to vector<8x128xf32>
    %81 = vector.extract_strided_slice %71 {offsets = [0, 128], sizes = [8, 128], strides = [1, 1]} : vector<8x256xf32> to vector<8x128xf32>
    %82 = arith.addf %80, %81 : vector<8x128xf32>
    %83 = arith.negf %82 : vector<8x128xf32>
    %84 = math.exp %83 : vector<8x128xf32>
    %cst_25 = arith.constant 1.000000e+00 : f32
    %85 = vector.broadcast %cst_25 : f32 to vector<8x128xf32>
    %86 = arith.addf %85, %84 : vector<8x128xf32>
    %87 = arith.divf %85, %86 : vector<8x128xf32>
    %cst_26 = arith.constant dense<0.000000e+00> : vector<8x128xf32>
    %88 = tpu.matmul %70, %6, %cst_26 {dimension_numbers = #tpu.dot_dimension_numbers<[1], [0], [0], [1], [0, 0, 1, 1], [], []>} : vector<8x128xbf16>, vector<128x128xbf16>, vector<8x128xf32> -> vector<8x128xf32>
    %89 = vector.extract_strided_slice %69 {offsets = [0, 256], sizes = [8, 128], strides = [1, 1]} : vector<8x384xf32> to vector<8x128xf32>
    %90 = vector.broadcast %7 : vector<1x128xf32> to vector<8x128xf32>
    %91 = arith.addf %88, %90 : vector<8x128xf32>
    %92 = arith.mulf %79, %91 : vector<8x128xf32>
    %93 = arith.addf %89, %92 : vector<8x128xf32>
    %94 = math.tanh %93 : vector<8x128xf32>
    %95 = arith.subf %53, %94 : vector<8x128xf32>
    %96 = arith.mulf %87, %95 : vector<8x128xf32>
    %97 = arith.addf %94, %96 : vector<8x128xf32>
    %98 = arith.addi %10, %c1_i32 : i32
    %99 = vector.broadcast %98 : i32 to vector<8x1xi32>
    %100 = arith.cmpi sgt, %8, %99 : vector<8x1xi32>
    %101 = vector.shape_cast %100 : vector<8x1xi1> to vector<8x1xi1>
    %102 = vector.broadcast %101 : vector<8x1xi1> to vector<8x128xi1>
    %103 = arith.select %102, %97, %53 : vector<8x128xi1>, vector<8x128xf32>
    %cst_27 = arith.constant 0.000000e+00 : f32
    %104 = vector.shape_cast %100 : vector<8x1xi1> to vector<8x1xi1>
    %105 = vector.broadcast %104 : vector<8x1xi1> to vector<8x128xi1>
    %106 = vector.broadcast %cst_27 : f32 to vector<8x128xf32>
    %107 = arith.select %105, %97, %106 : vector<8x128xi1>, vector<8x128xf32>
    %108 = arith.index_cast %c1_i32 : i32 to index
    %c0_28 = arith.constant 0 : index
    %c0_29 = arith.constant 0 : index
    %109 = vector.load %arg7[%108, %c0_28, %c0_29] : memref<8x8x128xf32, #tpu.memory_space<vmem>>, vector<1x8x128xf32>
    %110 = vector.shape_cast %109 : vector<1x8x128xf32> to vector<8x128xf32>
    %111 = vector.shape_cast %107 : vector<8x128xf32> to vector<1x8x128xf32>
    tpu.vector_store %arg7[%108, %c0_28, %c0_29], %111 {strides = array<i32>} : memref<8x8x128xf32, #tpu.memory_space<vmem>>, vector<1x8x128xf32>,
    %c2_i32 = arith.constant 2 : i32
    %112 = arith.index_cast %c2_i32 : i32 to index
    %c0_30 = arith.constant 0 : index
    %c0_31 = arith.constant 0 : index
    %113 = vector.load %arg2[%112, %c0_30, %c0_31] : memref<8x8x1xi32, #tpu.memory_space<vmem>>, vector<1x8x1xi32>
    %114 = vector.shape_cast %113 : vector<1x8x1xi32> to vector<8x1xi32>
    %115 = vector.broadcast %114 : vector<8x1xi32> to vector<8x16xi32>
    %116 = arith.cmpi eq, %115, %9 : vector<8x16xi32>
    %117 = arith.extui %116 : vector<8x16xi1> to vector<8x16xi32>
    %118 = arith.sitofp %117 : vector<8x16xi32> to vector<8x16xf32>
    %cst_32 = arith.constant dense<0.000000e+00> : vector<8x384xf32>
    %119 = tpu.matmul %118, %3, %cst_32 {dimension_numbers = #tpu.dot_dimension_numbers<[1], [0], [0], [1], [0, 0, 1, 1], [], []>} : vector<8x16xf32>, vector<16x384xf32>, vector<8x384xf32> -> vector<8x384xf32>
    %120 = arith.truncf %103 : vector<8x128xf32> to vector<8x128xbf16>
    %cst_33 = arith.constant dense<0.000000e+00> : vector<8x256xf32>
    %121 = tpu.matmul %120, %5, %cst_33 {dimension_numbers = #tpu.dot_dimension_numbers<[1], [0], [0], [1], [0, 0, 1, 1], [], []>} : vector<8x128xbf16>, vector<128x256xbf16>, vector<8x256xf32> -> vector<8x256xf32>
    %122 = vector.extract_strided_slice %119 {offsets = [0, 0], sizes = [8, 128], strides = [1, 1]} : vector<8x384xf32> to vector<8x128xf32>
    %123 = vector.extract_strided_slice %121 {offsets = [0, 0], sizes = [8, 128], strides = [1, 1]} : vector<8x256xf32> to vector<8x128xf32>
    %124 = arith.addf %122, %123 : vector<8x128xf32>
    %125 = arith.negf %124 : vector<8x128xf32>
    %126 = math.exp %125 : vector<8x128xf32>
    %cst_34 = arith.constant 1.000000e+00 : f32
    %127 = vector.broadcast %cst_34 : f32 to vector<8x128xf32>
    %128 = arith.addf %127, %126 : vector<8x128xf32>
    %129 = arith.divf %127, %128 : vector<8x128xf32>
    %130 = vector.extract_strided_slice %119 {offsets = [0, 128], sizes = [8, 128], strides = [1, 1]} : vector<8x384xf32> to vector<8x128xf32>
    %131 = vector.extract_strided_slice %121 {offsets = [0, 128], sizes = [8, 128], strides = [1, 1]} : vector<8x256xf32> to vector<8x128xf32>
    %132 = arith.addf %130, %131 : vector<8x128xf32>
    %133 = arith.negf %132 : vector<8x128xf32>
    %134 = math.exp %133 : vector<8x128xf32>
    %cst_35 = arith.constant 1.000000e+00 : f32
    %135 = vector.broadcast %cst_35 : f32 to vector<8x128xf32>
    %136 = arith.addf %135, %134 : vector<8x128xf32>
    %137 = arith.divf %135, %136 : vector<8x128xf32>
    %cst_36 = arith.constant dense<0.000000e+00> : vector<8x128xf32>
    %138 = tpu.matmul %120, %6, %cst_36 {dimension_numbers = #tpu.dot_dimension_numbers<[1], [0], [0], [1], [0, 0, 1, 1], [], []>} : vector<8x128xbf16>, vector<128x128xbf16>, vector<8x128xf32> -> vector<8x128xf32>
    %139 = vector.extract_strided_slice %119 {offsets = [0, 256], sizes = [8, 128], strides = [1, 1]} : vector<8x384xf32> to vector<8x128xf32>
    %140 = vector.broadcast %7 : vector<1x128xf32> to vector<8x128xf32>
    %141 = arith.addf %138, %140 : vector<8x128xf32>
    %142 = arith.mulf %129, %141 : vector<8x128xf32>
    %143 = arith.addf %139, %142 : vector<8x128xf32>
    %144 = math.tanh %143 : vector<8x128xf32>
    %145 = arith.subf %103, %144 : vector<8x128xf32>
    %146 = arith.mulf %137, %145 : vector<8x128xf32>
    %147 = arith.addf %144, %146 : vector<8x128xf32>
    %148 = arith.addi %10, %c2_i32 : i32
    %149 = vector.broadcast %148 : i32 to vector<8x1xi32>
    %150 = arith.cmpi sgt, %8, %149 : vector<8x1xi32>
    %151 = vector.shape_cast %150 : vector<8x1xi1> to vector<8x1xi1>
    %152 = vector.broadcast %151 : vector<8x1xi1> to vector<8x128xi1>
    %153 = arith.select %152, %147, %103 : vector<8x128xi1>, vector<8x128xf32>
    %cst_37 = arith.constant 0.000000e+00 : f32
    %154 = vector.shape_cast %150 : vector<8x1xi1> to vector<8x1xi1>
    %155 = vector.broadcast %154 : vector<8x1xi1> to vector<8x128xi1>
    %156 = vector.broadcast %cst_37 : f32 to vector<8x128xf32>
    %157 = arith.select %155, %147, %156 : vector<8x128xi1>, vector<8x128xf32>
    %158 = arith.index_cast %c2_i32 : i32 to index
    %c0_38 = arith.constant 0 : index
    %c0_39 = arith.constant 0 : index
    %159 = vector.load %arg7[%158, %c0_38, %c0_39] : memref<8x8x128xf32, #tpu.memory_space<vmem>>, vector<1x8x128xf32>
    %160 = vector.shape_cast %159 : vector<1x8x128xf32> to vector<8x128xf32>
    %161 = vector.shape_cast %157 : vector<8x128xf32> to vector<1x8x128xf32>
    tpu.vector_store %arg7[%158, %c0_38, %c0_39], %161 {strides = array<i32>} : memref<8x8x128xf32, #tpu.memory_space<vmem>>, vector<1x8x128xf32>,
    %c3_i32 = arith.constant 3 : i32
    %162 = arith.index_cast %c3_i32 : i32 to index
    %c0_40 = arith.constant 0 : index
    %c0_41 = arith.constant 0 : index
    %163 = vector.load %arg2[%162, %c0_40, %c0_41] : memref<8x8x1xi32, #tpu.memory_space<vmem>>, vector<1x8x1xi32>
    %164 = vector.shape_cast %163 : vector<1x8x1xi32> to vector<8x1xi32>
    %165 = vector.broadcast %164 : vector<8x1xi32> to vector<8x16xi32>
    %166 = arith.cmpi eq, %165, %9 : vector<8x16xi32>
    %167 = arith.extui %166 : vector<8x16xi1> to vector<8x16xi32>
    %168 = arith.sitofp %167 : vector<8x16xi32> to vector<8x16xf32>
    %cst_42 = arith.constant dense<0.000000e+00> : vector<8x384xf32>
    %169 = tpu.matmul %168, %3, %cst_42 {dimension_numbers = #tpu.dot_dimension_numbers<[1], [0], [0], [1], [0, 0, 1, 1], [], []>} : vector<8x16xf32>, vector<16x384xf32>, vector<8x384xf32> -> vector<8x384xf32>
    %170 = arith.truncf %153 : vector<8x128xf32> to vector<8x128xbf16>
    %cst_43 = arith.constant dense<0.000000e+00> : vector<8x256xf32>
    %171 = tpu.matmul %170, %5, %cst_43 {dimension_numbers = #tpu.dot_dimension_numbers<[1], [0], [0], [1], [0, 0, 1, 1], [], []>} : vector<8x128xbf16>, vector<128x256xbf16>, vector<8x256xf32> -> vector<8x256xf32>
    %172 = vector.extract_strided_slice %169 {offsets = [0, 0], sizes = [8, 128], strides = [1, 1]} : vector<8x384xf32> to vector<8x128xf32>
    %173 = vector.extract_strided_slice %171 {offsets = [0, 0], sizes = [8, 128], strides = [1, 1]} : vector<8x256xf32> to vector<8x128xf32>
    %174 = arith.addf %172, %173 : vector<8x128xf32>
    %175 = arith.negf %174 : vector<8x128xf32>
    %176 = math.exp %175 : vector<8x128xf32>
    %cst_44 = arith.constant 1.000000e+00 : f32
    %177 = vector.broadcast %cst_44 : f32 to vector<8x128xf32>
    %178 = arith.addf %177, %176 : vector<8x128xf32>
    %179 = arith.divf %177, %178 : vector<8x128xf32>
    %180 = vector.extract_strided_slice %169 {offsets = [0, 128], sizes = [8, 128], strides = [1, 1]} : vector<8x384xf32> to vector<8x128xf32>
    %181 = vector.extract_strided_slice %171 {offsets = [0, 128], sizes = [8, 128], strides = [1, 1]} : vector<8x256xf32> to vector<8x128xf32>
    %182 = arith.addf %180, %181 : vector<8x128xf32>
    %183 = arith.negf %182 : vector<8x128xf32>
    %184 = math.exp %183 : vector<8x128xf32>
    %cst_45 = arith.constant 1.000000e+00 : f32
    %185 = vector.broadcast %cst_45 : f32 to vector<8x128xf32>
    %186 = arith.addf %185, %184 : vector<8x128xf32>
    %187 = arith.divf %185, %186 : vector<8x128xf32>
    %cst_46 = arith.constant dense<0.000000e+00> : vector<8x128xf32>
    %188 = tpu.matmul %170, %6, %cst_46 {dimension_numbers = #tpu.dot_dimension_numbers<[1], [0], [0], [1], [0, 0, 1, 1], [], []>} : vector<8x128xbf16>, vector<128x128xbf16>, vector<8x128xf32> -> vector<8x128xf32>
    %189 = vector.extract_strided_slice %169 {offsets = [0, 256], sizes = [8, 128], strides = [1, 1]} : vector<8x384xf32> to vector<8x128xf32>
    %190 = vector.broadcast %7 : vector<1x128xf32> to vector<8x128xf32>
    %191 = arith.addf %188, %190 : vector<8x128xf32>
    %192 = arith.mulf %179, %191 : vector<8x128xf32>
    %193 = arith.addf %189, %192 : vector<8x128xf32>
    %194 = math.tanh %193 : vector<8x128xf32>
    %195 = arith.subf %153, %194 : vector<8x128xf32>
    %196 = arith.mulf %187, %195 : vector<8x128xf32>
    %197 = arith.addf %194, %196 : vector<8x128xf32>
    %198 = arith.addi %10, %c3_i32 : i32
    %199 = vector.broadcast %198 : i32 to vector<8x1xi32>
    %200 = arith.cmpi sgt, %8, %199 : vector<8x1xi32>
    %201 = vector.shape_cast %200 : vector<8x1xi1> to vector<8x1xi1>
    %202 = vector.broadcast %201 : vector<8x1xi1> to vector<8x128xi1>
    %203 = arith.select %202, %197, %153 : vector<8x128xi1>, vector<8x128xf32>
    %cst_47 = arith.constant 0.000000e+00 : f32
    %204 = vector.shape_cast %200 : vector<8x1xi1> to vector<8x1xi1>
    %205 = vector.broadcast %204 : vector<8x1xi1> to vector<8x128xi1>
    %206 = vector.broadcast %cst_47 : f32 to vector<8x128xf32>
    %207 = arith.select %205, %197, %206 : vector<8x128xi1>, vector<8x128xf32>
    %208 = arith.index_cast %c3_i32 : i32 to index
    %c0_48 = arith.constant 0 : index
    %c0_49 = arith.constant 0 : index
    %209 = vector.load %arg7[%208, %c0_48, %c0_49] : memref<8x8x128xf32, #tpu.memory_space<vmem>>, vector<1x8x128xf32>
    %210 = vector.shape_cast %209 : vector<1x8x128xf32> to vector<8x128xf32>
    %211 = vector.shape_cast %207 : vector<8x128xf32> to vector<1x8x128xf32>
    tpu.vector_store %arg7[%208, %c0_48, %c0_49], %211 {strides = array<i32>} : memref<8x8x128xf32, #tpu.memory_space<vmem>>, vector<1x8x128xf32>,
    %c4_i32 = arith.constant 4 : i32
    %212 = arith.index_cast %c4_i32 : i32 to index
    %c0_50 = arith.constant 0 : index
    %c0_51 = arith.constant 0 : index
    %213 = vector.load %arg2[%212, %c0_50, %c0_51] : memref<8x8x1xi32, #tpu.memory_space<vmem>>, vector<1x8x1xi32>
    %214 = vector.shape_cast %213 : vector<1x8x1xi32> to vector<8x1xi32>
    %215 = vector.broadcast %214 : vector<8x1xi32> to vector<8x16xi32>
    %216 = arith.cmpi eq, %215, %9 : vector<8x16xi32>
    %217 = arith.extui %216 : vector<8x16xi1> to vector<8x16xi32>
    %218 = arith.sitofp %217 : vector<8x16xi32> to vector<8x16xf32>
    %cst_52 = arith.constant dense<0.000000e+00> : vector<8x384xf32>
    %219 = tpu.matmul %218, %3, %cst_52 {dimension_numbers = #tpu.dot_dimension_numbers<[1], [0], [0], [1], [0, 0, 1, 1], [], []>} : vector<8x16xf32>, vector<16x384xf32>, vector<8x384xf32> -> vector<8x384xf32>
    %220 = arith.truncf %203 : vector<8x128xf32> to vector<8x128xbf16>
    %cst_53 = arith.constant dense<0.000000e+00> : vector<8x256xf32>
    %221 = tpu.matmul %220, %5, %cst_53 {dimension_numbers = #tpu.dot_dimension_numbers<[1], [0], [0], [1], [0, 0, 1, 1], [], []>} : vector<8x128xbf16>, vector<128x256xbf16>, vector<8x256xf32> -> vector<8x256xf32>
    %222 = vector.extract_strided_slice %219 {offsets = [0, 0], sizes = [8, 128], strides = [1, 1]} : vector<8x384xf32> to vector<8x128xf32>
    %223 = vector.extract_strided_slice %221 {offsets = [0, 0], sizes = [8, 128], strides = [1, 1]} : vector<8x256xf32> to vector<8x128xf32>
    %224 = arith.addf %222, %223 : vector<8x128xf32>
    %225 = arith.negf %224 : vector<8x128xf32>
    %226 = math.exp %225 : vector<8x128xf32>
    %cst_54 = arith.constant 1.000000e+00 : f32
    %227 = vector.broadcast %cst_54 : f32 to vector<8x128xf32>
    %228 = arith.addf %227, %226 : vector<8x128xf32>
    %229 = arith.divf %227, %228 : vector<8x128xf32>
    %230 = vector.extract_strided_slice %219 {offsets = [0, 128], sizes = [8, 128], strides = [1, 1]} : vector<8x384xf32> to vector<8x128xf32>
    %231 = vector.extract_strided_slice %221 {offsets = [0, 128], sizes = [8, 128], strides = [1, 1]} : vector<8x256xf32> to vector<8x128xf32>
    %232 = arith.addf %230, %231 : vector<8x128xf32>
    %233 = arith.negf %232 : vector<8x128xf32>
    %234 = math.exp %233 : vector<8x128xf32>
    %cst_55 = arith.constant 1.000000e+00 : f32
    %235 = vector.broadcast %cst_55 : f32 to vector<8x128xf32>
    %236 = arith.addf %235, %234 : vector<8x128xf32>
    %237 = arith.divf %235, %236 : vector<8x128xf32>
    %cst_56 = arith.constant dense<0.000000e+00> : vector<8x128xf32>
    %238 = tpu.matmul %220, %6, %cst_56 {dimension_numbers = #tpu.dot_dimension_numbers<[1], [0], [0], [1], [0, 0, 1, 1], [], []>} : vector<8x128xbf16>, vector<128x128xbf16>, vector<8x128xf32> -> vector<8x128xf32>
    %239 = vector.extract_strided_slice %219 {offsets = [0, 256], sizes = [8, 128], strides = [1, 1]} : vector<8x384xf32> to vector<8x128xf32>
    %240 = vector.broadcast %7 : vector<1x128xf32> to vector<8x128xf32>
    %241 = arith.addf %238, %240 : vector<8x128xf32>
    %242 = arith.mulf %229, %241 : vector<8x128xf32>
    %243 = arith.addf %239, %242 : vector<8x128xf32>
    %244 = math.tanh %243 : vector<8x128xf32>
    %245 = arith.subf %203, %244 : vector<8x128xf32>
    %246 = arith.mulf %237, %245 : vector<8x128xf32>
    %247 = arith.addf %244, %246 : vector<8x128xf32>
    %248 = arith.addi %10, %c4_i32 : i32
    %249 = vector.broadcast %248 : i32 to vector<8x1xi32>
    %250 = arith.cmpi sgt, %8, %249 : vector<8x1xi32>
    %251 = vector.shape_cast %250 : vector<8x1xi1> to vector<8x1xi1>
    %252 = vector.broadcast %251 : vector<8x1xi1> to vector<8x128xi1>
    %253 = arith.select %252, %247, %203 : vector<8x128xi1>, vector<8x128xf32>
    %cst_57 = arith.constant 0.000000e+00 : f32
    %254 = vector.shape_cast %250 : vector<8x1xi1> to vector<8x1xi1>
    %255 = vector.broadcast %254 : vector<8x1xi1> to vector<8x128xi1>
    %256 = vector.broadcast %cst_57 : f32 to vector<8x128xf32>
    %257 = arith.select %255, %247, %256 : vector<8x128xi1>, vector<8x128xf32>
    %258 = arith.index_cast %c4_i32 : i32 to index
    %c0_58 = arith.constant 0 : index
    %c0_59 = arith.constant 0 : index
    %259 = vector.load %arg7[%258, %c0_58, %c0_59] : memref<8x8x128xf32, #tpu.memory_space<vmem>>, vector<1x8x128xf32>
    %260 = vector.shape_cast %259 : vector<1x8x128xf32> to vector<8x128xf32>
    %261 = vector.shape_cast %257 : vector<8x128xf32> to vector<1x8x128xf32>
    tpu.vector_store %arg7[%258, %c0_58, %c0_59], %261 {strides = array<i32>} : memref<8x8x128xf32, #tpu.memory_space<vmem>>, vector<1x8x128xf32>,
    %c5_i32 = arith.constant 5 : i32
    %262 = arith.index_cast %c5_i32 : i32 to index
    %c0_60 = arith.constant 0 : index
    %c0_61 = arith.constant 0 : index
    %263 = vector.load %arg2[%262, %c0_60, %c0_61] : memref<8x8x1xi32, #tpu.memory_space<vmem>>, vector<1x8x1xi32>
    %264 = vector.shape_cast %263 : vector<1x8x1xi32> to vector<8x1xi32>
    %265 = vector.broadcast %264 : vector<8x1xi32> to vector<8x16xi32>
    %266 = arith.cmpi eq, %265, %9 : vector<8x16xi32>
    %267 = arith.extui %266 : vector<8x16xi1> to vector<8x16xi32>
    %268 = arith.sitofp %267 : vector<8x16xi32> to vector<8x16xf32>
    %cst_62 = arith.constant dense<0.000000e+00> : vector<8x384xf32>
    %269 = tpu.matmul %268, %3, %cst_62 {dimension_numbers = #tpu.dot_dimension_numbers<[1], [0], [0], [1], [0, 0, 1, 1], [], []>} : vector<8x16xf32>, vector<16x384xf32>, vector<8x384xf32> -> vector<8x384xf32>
    %270 = arith.truncf %253 : vector<8x128xf32> to vector<8x128xbf16>
    %cst_63 = arith.constant dense<0.000000e+00> : vector<8x256xf32>
    %271 = tpu.matmul %270, %5, %cst_63 {dimension_numbers = #tpu.dot_dimension_numbers<[1], [0], [0], [1], [0, 0, 1, 1], [], []>} : vector<8x128xbf16>, vector<128x256xbf16>, vector<8x256xf32> -> vector<8x256xf32>
    %272 = vector.extract_strided_slice %269 {offsets = [0, 0], sizes = [8, 128], strides = [1, 1]} : vector<8x384xf32> to vector<8x128xf32>
    %273 = vector.extract_strided_slice %271 {offsets = [0, 0], sizes = [8, 128], strides = [1, 1]} : vector<8x256xf32> to vector<8x128xf32>
    %274 = arith.addf %272, %273 : vector<8x128xf32>
    %275 = arith.negf %274 : vector<8x128xf32>
    %276 = math.exp %275 : vector<8x128xf32>
    %cst_64 = arith.constant 1.000000e+00 : f32
    %277 = vector.broadcast %cst_64 : f32 to vector<8x128xf32>
    %278 = arith.addf %277, %276 : vector<8x128xf32>
    %279 = arith.divf %277, %278 : vector<8x128xf32>
    %280 = vector.extract_strided_slice %269 {offsets = [0, 128], sizes = [8, 128], strides = [1, 1]} : vector<8x384xf32> to vector<8x128xf32>
    %281 = vector.extract_strided_slice %271 {offsets = [0, 128], sizes = [8, 128], strides = [1, 1]} : vector<8x256xf32> to vector<8x128xf32>
    %282 = arith.addf %280, %281 : vector<8x128xf32>
    %283 = arith.negf %282 : vector<8x128xf32>
    %284 = math.exp %283 : vector<8x128xf32>
    %cst_65 = arith.constant 1.000000e+00 : f32
    %285 = vector.broadcast %cst_65 : f32 to vector<8x128xf32>
    %286 = arith.addf %285, %284 : vector<8x128xf32>
    %287 = arith.divf %285, %286 : vector<8x128xf32>
    %cst_66 = arith.constant dense<0.000000e+00> : vector<8x128xf32>
    %288 = tpu.matmul %270, %6, %cst_66 {dimension_numbers = #tpu.dot_dimension_numbers<[1], [0], [0], [1], [0, 0, 1, 1], [], []>} : vector<8x128xbf16>, vector<128x128xbf16>, vector<8x128xf32> -> vector<8x128xf32>
    %289 = vector.extract_strided_slice %269 {offsets = [0, 256], sizes = [8, 128], strides = [1, 1]} : vector<8x384xf32> to vector<8x128xf32>
    %290 = vector.broadcast %7 : vector<1x128xf32> to vector<8x128xf32>
    %291 = arith.addf %288, %290 : vector<8x128xf32>
    %292 = arith.mulf %279, %291 : vector<8x128xf32>
    %293 = arith.addf %289, %292 : vector<8x128xf32>
    %294 = math.tanh %293 : vector<8x128xf32>
    %295 = arith.subf %253, %294 : vector<8x128xf32>
    %296 = arith.mulf %287, %295 : vector<8x128xf32>
    %297 = arith.addf %294, %296 : vector<8x128xf32>
    %298 = arith.addi %10, %c5_i32 : i32
    %299 = vector.broadcast %298 : i32 to vector<8x1xi32>
    %300 = arith.cmpi sgt, %8, %299 : vector<8x1xi32>
    %301 = vector.shape_cast %300 : vector<8x1xi1> to vector<8x1xi1>
    %302 = vector.broadcast %301 : vector<8x1xi1> to vector<8x128xi1>
    %303 = arith.select %302, %297, %253 : vector<8x128xi1>, vector<8x128xf32>
    %cst_67 = arith.constant 0.000000e+00 : f32
    %304 = vector.shape_cast %300 : vector<8x1xi1> to vector<8x1xi1>
    %305 = vector.broadcast %304 : vector<8x1xi1> to vector<8x128xi1>
    %306 = vector.broadcast %cst_67 : f32 to vector<8x128xf32>
    %307 = arith.select %305, %297, %306 : vector<8x128xi1>, vector<8x128xf32>
    %308 = arith.index_cast %c5_i32 : i32 to index
    %c0_68 = arith.constant 0 : index
    %c0_69 = arith.constant 0 : index
    %309 = vector.load %arg7[%308, %c0_68, %c0_69] : memref<8x8x128xf32, #tpu.memory_space<vmem>>, vector<1x8x128xf32>
    %310 = vector.shape_cast %309 : vector<1x8x128xf32> to vector<8x128xf32>
    %311 = vector.shape_cast %307 : vector<8x128xf32> to vector<1x8x128xf32>
    tpu.vector_store %arg7[%308, %c0_68, %c0_69], %311 {strides = array<i32>} : memref<8x8x128xf32, #tpu.memory_space<vmem>>, vector<1x8x128xf32>,
    %c6_i32 = arith.constant 6 : i32
    %312 = arith.index_cast %c6_i32 : i32 to index
    %c0_70 = arith.constant 0 : index
    %c0_71 = arith.constant 0 : index
    %313 = vector.load %arg2[%312, %c0_70, %c0_71] : memref<8x8x1xi32, #tpu.memory_space<vmem>>, vector<1x8x1xi32>
    %314 = vector.shape_cast %313 : vector<1x8x1xi32> to vector<8x1xi32>
    %315 = vector.broadcast %314 : vector<8x1xi32> to vector<8x16xi32>
    %316 = arith.cmpi eq, %315, %9 : vector<8x16xi32>
    %317 = arith.extui %316 : vector<8x16xi1> to vector<8x16xi32>
    %318 = arith.sitofp %317 : vector<8x16xi32> to vector<8x16xf32>
    %cst_72 = arith.constant dense<0.000000e+00> : vector<8x384xf32>
    %319 = tpu.matmul %318, %3, %cst_72 {dimension_numbers = #tpu.dot_dimension_numbers<[1], [0], [0], [1], [0, 0, 1, 1], [], []>} : vector<8x16xf32>, vector<16x384xf32>, vector<8x384xf32> -> vector<8x384xf32>
    %320 = arith.truncf %303 : vector<8x128xf32> to vector<8x128xbf16>
    %cst_73 = arith.constant dense<0.000000e+00> : vector<8x256xf32>
    %321 = tpu.matmul %320, %5, %cst_73 {dimension_numbers = #tpu.dot_dimension_numbers<[1], [0], [0], [1], [0, 0, 1, 1], [], []>} : vector<8x128xbf16>, vector<128x256xbf16>, vector<8x256xf32> -> vector<8x256xf32>
    %322 = vector.extract_strided_slice %319 {offsets = [0, 0], sizes = [8, 128], strides = [1, 1]} : vector<8x384xf32> to vector<8x128xf32>
    %323 = vector.extract_strided_slice %321 {offsets = [0, 0], sizes = [8, 128], strides = [1, 1]} : vector<8x256xf32> to vector<8x128xf32>
    %324 = arith.addf %322, %323 : vector<8x128xf32>
    %325 = arith.negf %324 : vector<8x128xf32>
    %326 = math.exp %325 : vector<8x128xf32>
    %cst_74 = arith.constant 1.000000e+00 : f32
    %327 = vector.broadcast %cst_74 : f32 to vector<8x128xf32>
    %328 = arith.addf %327, %326 : vector<8x128xf32>
    %329 = arith.divf %327, %328 : vector<8x128xf32>
    %330 = vector.extract_strided_slice %319 {offsets = [0, 128], sizes = [8, 128], strides = [1, 1]} : vector<8x384xf32> to vector<8x128xf32>
    %331 = vector.extract_strided_slice %321 {offsets = [0, 128], sizes = [8, 128], strides = [1, 1]} : vector<8x256xf32> to vector<8x128xf32>
    %332 = arith.addf %330, %331 : vector<8x128xf32>
    %333 = arith.negf %332 : vector<8x128xf32>
    %334 = math.exp %333 : vector<8x128xf32>
    %cst_75 = arith.constant 1.000000e+00 : f32
    %335 = vector.broadcast %cst_75 : f32 to vector<8x128xf32>
    %336 = arith.addf %335, %334 : vector<8x128xf32>
    %337 = arith.divf %335, %336 : vector<8x128xf32>
    %cst_76 = arith.constant dense<0.000000e+00> : vector<8x128xf32>
    %338 = tpu.matmul %320, %6, %cst_76 {dimension_numbers = #tpu.dot_dimension_numbers<[1], [0], [0], [1], [0, 0, 1, 1], [], []>} : vector<8x128xbf16>, vector<128x128xbf16>, vector<8x128xf32> -> vector<8x128xf32>
    %339 = vector.extract_strided_slice %319 {offsets = [0, 256], sizes = [8, 128], strides = [1, 1]} : vector<8x384xf32> to vector<8x128xf32>
    %340 = vector.broadcast %7 : vector<1x128xf32> to vector<8x128xf32>
    %341 = arith.addf %338, %340 : vector<8x128xf32>
    %342 = arith.mulf %329, %341 : vector<8x128xf32>
    %343 = arith.addf %339, %342 : vector<8x128xf32>
    %344 = math.tanh %343 : vector<8x128xf32>
    %345 = arith.subf %303, %344 : vector<8x128xf32>
    %346 = arith.mulf %337, %345 : vector<8x128xf32>
    %347 = arith.addf %344, %346 : vector<8x128xf32>
    %348 = arith.addi %10, %c6_i32 : i32
    %349 = vector.broadcast %348 : i32 to vector<8x1xi32>
    %350 = arith.cmpi sgt, %8, %349 : vector<8x1xi32>
    %351 = vector.shape_cast %350 : vector<8x1xi1> to vector<8x1xi1>
    %352 = vector.broadcast %351 : vector<8x1xi1> to vector<8x128xi1>
    %353 = arith.select %352, %347, %303 : vector<8x128xi1>, vector<8x128xf32>
    %cst_77 = arith.constant 0.000000e+00 : f32
    %354 = vector.shape_cast %350 : vector<8x1xi1> to vector<8x1xi1>
    %355 = vector.broadcast %354 : vector<8x1xi1> to vector<8x128xi1>
    %356 = vector.broadcast %cst_77 : f32 to vector<8x128xf32>
    %357 = arith.select %355, %347, %356 : vector<8x128xi1>, vector<8x128xf32>
    %358 = arith.index_cast %c6_i32 : i32 to index
    %c0_78 = arith.constant 0 : index
    %c0_79 = arith.constant 0 : index
    %359 = vector.load %arg7[%358, %c0_78, %c0_79] : memref<8x8x128xf32, #tpu.memory_space<vmem>>, vector<1x8x128xf32>
    %360 = vector.shape_cast %359 : vector<1x8x128xf32> to vector<8x128xf32>
    %361 = vector.shape_cast %357 : vector<8x128xf32> to vector<1x8x128xf32>
    tpu.vector_store %arg7[%358, %c0_78, %c0_79], %361 {strides = array<i32>} : memref<8x8x128xf32, #tpu.memory_space<vmem>>, vector<1x8x128xf32>,
    %c7_i32 = arith.constant 7 : i32
    %362 = arith.index_cast %c7_i32 : i32 to index
    %c0_80 = arith.constant 0 : index
    %c0_81 = arith.constant 0 : index
    %363 = vector.load %arg2[%362, %c0_80, %c0_81] : memref<8x8x1xi32, #tpu.memory_space<vmem>>, vector<1x8x1xi32>
    %364 = vector.shape_cast %363 : vector<1x8x1xi32> to vector<8x1xi32>
    %365 = vector.broadcast %364 : vector<8x1xi32> to vector<8x16xi32>
    %366 = arith.cmpi eq, %365, %9 : vector<8x16xi32>
    %367 = arith.extui %366 : vector<8x16xi1> to vector<8x16xi32>
    %368 = arith.sitofp %367 : vector<8x16xi32> to vector<8x16xf32>
    %cst_82 = arith.constant dense<0.000000e+00> : vector<8x384xf32>
    %369 = tpu.matmul %368, %3, %cst_82 {dimension_numbers = #tpu.dot_dimension_numbers<[1], [0], [0], [1], [0, 0, 1, 1], [], []>} : vector<8x16xf32>, vector<16x384xf32>, vector<8x384xf32> -> vector<8x384xf32>
    %370 = arith.truncf %353 : vector<8x128xf32> to vector<8x128xbf16>
    %cst_83 = arith.constant dense<0.000000e+00> : vector<8x256xf32>
    %371 = tpu.matmul %370, %5, %cst_83 {dimension_numbers = #tpu.dot_dimension_numbers<[1], [0], [0], [1], [0, 0, 1, 1], [], []>} : vector<8x128xbf16>, vector<128x256xbf16>, vector<8x256xf32> -> vector<8x256xf32>
    %372 = vector.extract_strided_slice %369 {offsets = [0, 0], sizes = [8, 128], strides = [1, 1]} : vector<8x384xf32> to vector<8x128xf32>
    %373 = vector.extract_strided_slice %371 {offsets = [0, 0], sizes = [8, 128], strides = [1, 1]} : vector<8x256xf32> to vector<8x128xf32>
    %374 = arith.addf %372, %373 : vector<8x128xf32>
    %375 = arith.negf %374 : vector<8x128xf32>
    %376 = math.exp %375 : vector<8x128xf32>
    %cst_84 = arith.constant 1.000000e+00 : f32
    %377 = vector.broadcast %cst_84 : f32 to vector<8x128xf32>
    %378 = arith.addf %377, %376 : vector<8x128xf32>
    %379 = arith.divf %377, %378 : vector<8x128xf32>
    %380 = vector.extract_strided_slice %369 {offsets = [0, 128], sizes = [8, 128], strides = [1, 1]} : vector<8x384xf32> to vector<8x128xf32>
    %381 = vector.extract_strided_slice %371 {offsets = [0, 128], sizes = [8, 128], strides = [1, 1]} : vector<8x256xf32> to vector<8x128xf32>
    %382 = arith.addf %380, %381 : vector<8x128xf32>
    %383 = arith.negf %382 : vector<8x128xf32>
    %384 = math.exp %383 : vector<8x128xf32>
    %cst_85 = arith.constant 1.000000e+00 : f32
    %385 = vector.broadcast %cst_85 : f32 to vector<8x128xf32>
    %386 = arith.addf %385, %384 : vector<8x128xf32>
    %387 = arith.divf %385, %386 : vector<8x128xf32>
    %cst_86 = arith.constant dense<0.000000e+00> : vector<8x128xf32>
    %388 = tpu.matmul %370, %6, %cst_86 {dimension_numbers = #tpu.dot_dimension_numbers<[1], [0], [0], [1], [0, 0, 1, 1], [], []>} : vector<8x128xbf16>, vector<128x128xbf16>, vector<8x128xf32> -> vector<8x128xf32>
    %389 = vector.extract_strided_slice %369 {offsets = [0, 256], sizes = [8, 128], strides = [1, 1]} : vector<8x384xf32> to vector<8x128xf32>
    %390 = vector.broadcast %7 : vector<1x128xf32> to vector<8x128xf32>
    %391 = arith.addf %388, %390 : vector<8x128xf32>
    %392 = arith.mulf %379, %391 : vector<8x128xf32>
    %393 = arith.addf %389, %392 : vector<8x128xf32>
    %394 = math.tanh %393 : vector<8x128xf32>
    %395 = arith.subf %353, %394 : vector<8x128xf32>
    %396 = arith.mulf %387, %395 : vector<8x128xf32>
    %397 = arith.addf %394, %396 : vector<8x128xf32>
    %398 = arith.addi %10, %c7_i32 : i32
    %399 = vector.broadcast %398 : i32 to vector<8x1xi32>
    %400 = arith.cmpi sgt, %8, %399 : vector<8x1xi32>
    %401 = vector.shape_cast %400 : vector<8x1xi1> to vector<8x1xi1>
    %402 = vector.broadcast %401 : vector<8x1xi1> to vector<8x128xi1>
    %403 = arith.select %402, %397, %353 : vector<8x128xi1>, vector<8x128xf32>
    %cst_87 = arith.constant 0.000000e+00 : f32
    %404 = vector.shape_cast %400 : vector<8x1xi1> to vector<8x1xi1>
    %405 = vector.broadcast %404 : vector<8x1xi1> to vector<8x128xi1>
    %406 = vector.broadcast %cst_87 : f32 to vector<8x128xf32>
    %407 = arith.select %405, %397, %406 : vector<8x128xi1>, vector<8x128xf32>
    %408 = arith.index_cast %c7_i32 : i32 to index
    %c0_88 = arith.constant 0 : index
    %c0_89 = arith.constant 0 : index
    %409 = vector.load %arg7[%408, %c0_88, %c0_89] : memref<8x8x128xf32, #tpu.memory_space<vmem>>, vector<1x8x128xf32>
    %410 = vector.shape_cast %409 : vector<1x8x128xf32> to vector<8x128xf32>
    %411 = vector.shape_cast %407 : vector<8x128xf32> to vector<1x8x128xf32>
    tpu.vector_store %arg7[%408, %c0_88, %c0_89], %411 {strides = array<i32>} : memref<8x8x128xf32, #tpu.memory_space<vmem>>, vector<1x8x128xf32>,
    %c8_i32_90 = arith.constant 8 : i32
    %c0_91 = arith.constant 0 : index
    %c0_92 = arith.constant 0 : index
    %412 = vector.load %arg9[%c0_91, %c0_92] : memref<8x128xf32, #tpu.memory_space<vmem>>, vector<8x128xf32>
    tpu.vector_store %arg9[%c0_91, %c0_92], %403 {strides = array<i32>} : memref<8x128xf32, #tpu.memory_space<vmem>>, vector<8x128xf32>,
    %c0_93 = arith.constant 0 : index
    %c0_94 = arith.constant 0 : index
    %c0_95 = arith.constant 0 : index
    %413 = vector.load %arg8[%c0_93, %c0_94, %c0_95] : memref<1x8x128xf32, #tpu.memory_space<vmem>>, vector<1x8x128xf32>
    %414 = vector.shape_cast %413 : vector<1x8x128xf32> to vector<8x128xf32>
    %415 = vector.shape_cast %403 : vector<8x128xf32> to vector<1x8x128xf32>
    tpu.vector_store %arg8[%c0_93, %c0_94, %c0_95], %415 {strides = array<i32>} : memref<1x8x128xf32, #tpu.memory_space<vmem>>, vector<1x8x128xf32>,
    return
  }
  func.func @transform_0(%arg0: i32, %arg1: i32) -> (i32, i32, i32) {
    %c0_i32 = arith.constant 0 : i32
    %c0_i32_0 = arith.constant 0 : i32
    return %arg1, %arg0, %c0_i32 : i32, i32, i32
  }
  func.func @transform_1(%arg0: i32, %arg1: i32) -> (i32, i32) {
    %c0_i32 = arith.constant 0 : i32
    %c0_i32_0 = arith.constant 0 : i32
    %c0_i32_1 = arith.constant 0 : i32
    return %c0_i32, %c0_i32_0 : i32, i32
  }
  func.func @transform_2(%arg0: i32, %arg1: i32) -> (i32, i32) {
    %c0_i32 = arith.constant 0 : i32
    %c0_i32_0 = arith.constant 0 : i32
    %c0_i32_1 = arith.constant 0 : i32
    return %c0_i32, %c0_i32_0 : i32, i32
  }
  func.func @transform_3(%arg0: i32, %arg1: i32) -> (i32, i32) {
    %c0_i32 = arith.constant 0 : i32
    %c0_i32_0 = arith.constant 0 : i32
    %c0_i32_1 = arith.constant 0 : i32
    return %c0_i32, %c0_i32_0 : i32, i32
  }
  func.func @transform_4(%arg0: i32, %arg1: i32) -> (i32, i32) {
    %c0_i32 = arith.constant 0 : i32
    %c0_i32_0 = arith.constant 0 : i32
    return %arg0, %c0_i32 : i32, i32
  }
  func.func @transform_5(%arg0: i32, %arg1: i32) -> (i32, i32, i32) {
    %c0_i32 = arith.constant 0 : i32
    %c0_i32_0 = arith.constant 0 : i32
    return %arg1, %arg0, %c0_i32 : i32, i32, i32
  }
  func.func @transform_6(%arg0: i32, %arg1: i32) -> (i32, i32, i32) {
    %c0_i32 = arith.constant 0 : i32
    %c0_i32_0 = arith.constant 0 : i32
    %c0_i32_1 = arith.constant 0 : i32
    return %c0_i32, %arg0, %c0_i32_0 : i32, i32, i32
  }
}

</mosaic_0001>

<bundles_post_ra>
// kernel: encoder_forward.1
= control target key start
LH: loop header
LB: loop body
LE: loop exit
PB: predicated region body
PF: predicated region fallthrough
CT: control target
= control target key end

     0   :  { %v1847_v0 = vmov 0   ;;  %v1848_v62 = vmov 0.0|0.0   ;;  %vm78_vm4 = vcmask 130048   ;;  %s2551_s0 = inlined_call_operand.vmem [shape: s32[8,8,1], index: 0, kind: input, shape index: {}]   ;;  %s2552_s4 = inlined_call_operand.vmem [shape: s32[8,1], index: 4, kind: input, shape index: {}]   ;;  %s2553_s2 = inlined_call_operand.vmem [shape: bf16[128,384], index: 2, kind: input, shape index: {}]   ;;  %s2554_s1 = inlined_call_operand.vmem [shape: f32[16,384], index: 1, kind: input, shape index: {}]   ;;  %s2555_s3 = inlined_call_operand.vmem [shape: f32[1,128], index: 3, kind: input, shape index: {}]   ;;  %s2556_s5 = inlined_call_operand.vmem [shape: f32[8,8,128], index: 5, kind: output, shape index: {0}]   ;;  %s2557_s6 = inlined_call_operand.vmem [shape: f32[1,8,128], index: 6, kind: output, shape index: {1}]  }
   0x1   :  { %1756 = vset.pattern.permute.xlu0 %v1847_v0  ;;  %v71_v1 = vld [vmem:[%s2551_s0] sm:$0xff]  ;;  %1757 = vset.pattern.permute.xlu1 %v1847_v0  ;;  %v1664_v2 = vld [vmem:[%s2551_s0 + $0x8] sm:$0xff]  ;;  %v1742_v5 = vld [vmem:[%s2553_s2 + $0xb0] sm:$0xf0] }
   0x2   :  { %73 = vperm.xlu0 %1756, %v71_v1   ;;  %1758 = vset.pattern.permute.xlu2 %v1847_v0  ;;  %v1897_v3 = vld [vmem:[%s2552_s4] sm:$0xff]  ;;  %v1624_v4 = vld [vmem:[%s2553_s2 + $0xa8] sm:$0xf]  ;;  %v1616_v6 = vld [vmem:[%s2553_s2 + $0x90] sm:$0xf] }
   0x3   :  { %v1908_v7 = vor.u32 %v1742_v5, %v1624_v4  ;;  %v1739_v8 = vld [vmem:[%s2553_s2 + $0x98] sm:$0xf0]  ;;  %vm697_vm0 = vcmp.gt.s32.totalorder %v1897_v3, 2  ;;  %v1608_v10 = vld [vmem:[%s2553_s2 + $0x78] sm:$0xf]  ;;  %v1932_v13 = vld [vmem:[%s2554_s1] sm:$0xff] }
   0x4   :  { %v1915_v9 = vor.u32 %v1739_v8, %v1616_v6  ;;  %v1923_v11 = vld [vmem:[%s2554_s1 + $0x18] sm:$0xff]  ;;  %v1736_v12 = vld [vmem:[%s2553_s2 + $0x80] sm:$0xf0]  ;;  %v1741_v14 = vld [vmem:[%s2553_s2 + $0xac] sm:$0xf]  ;;  %v698_v15 = vsel %vm697_vm0, 1, %v1847_v0 }
   0x5   :  { %223 = vmatpush.bf16.msra.mxu3 %v1908_v7  ;;  %96 = vmatpush.msra.mxu0 %v1923_v11  ;;  %v1626_v16 = vld [vmem:[%s2553_s2 + $0xb4] sm:$0xf0]  ;;  %v1738_v18 = vld [vmem:[%s2553_s2 + $0x94] sm:$0xf]  ;;  %v1618_v19 = vld [vmem:[%s2553_s2 + $0x9c] sm:$0xf0]  ;;  %v1951_v20 = vor.u32 %v1736_v12, %v1608_v10 }
   0x6   :  { %v1942_v17 = vor.u32 %v1741_v14, %v1626_v16  ;;  %v1600_v21 = vld [vmem:[%s2553_s2 + $0x60] sm:$0xf]  ;;  %v1733_v22 = vld [vmem:[%s2553_s2 + $0x68] sm:$0xf0]  ;;  %v1960_v23 = vor.u32 %v1738_v18, %v1618_v19  ;;  %v1662_v24 = vld [vmem:[%s2553_s2 + $0xb0] sm:$0xf] }
   0x7   :  { %97 = vmatpush.msra.mxu0 %v1932_v13  ;;  %v1735_v25 = vld [vmem:[%s2553_s2 + $0x7c] sm:$0xf]  ;;  %v1610_v26 = vld [vmem:[%s2553_s2 + $0x84] sm:$0xf0]  ;;  %v1658_v29 = vld [vmem:[%s2553_s2 + $0x98] sm:$0xf]  ;;  %v1988_v32 = vor.u32 %v1733_v22, %v1600_v21 }
   0x8   :  { %v1743_v27 = vld [vmem:[%s2553_s2 + $0xb8] sm:$0xf0]  ;;  %v1740_v30 = vld [vmem:[%s2553_s2 + $0xa0] sm:$0xf0]  ;;  %v1592_v33 = vld [vmem:[%s2553_s2 + $0x48] sm:$0xf]  ;;  %v1998_v35 = vor.u32 %v1735_v25, %v1610_v26 }
   0x9   :  { %224 = vmatpush.bf16.msra.mxu3 %v1915_v9  ;;  %236 = vmatpush.bf16.msrb.mxu0 %v1942_v17  ;;  %v1974_v28 = vor.u32 %v1743_v27, %v1662_v24  ;;  %v1985_v31 = vld [vmem:[%s2554_s1 + $0x20] sm:$0xff]  ;;  %v1730_v34 = vld [vmem:[%s2553_s2 + $0x50] sm:$0xf0]  ;;  %v1696_v36 = vld [vmem:[%s2551_s0 + $0x28] sm:$0xff]  ;;  %v2010_v39 = vor.u32 %v1740_v30, %v1658_v29  ;;  %vm1204_vm1 = vcmp.gt.s32.totalorder %v1897_v3, 5  ;;  %vm1542_vm2 = vcmp.gt.s32.totalorder %v1897_v3, 7 }
   0xa   :  { %372 = vperm.xlu0 %1756, %v1664_v2   ;;  %116 = vmatpush.msra.mxu2 %v1985_v31  ;;  %v1732_v37 = vld [vmem:[%s2553_s2 + $0x64] sm:$0xf]  ;;  %v1602_v38 = vld [vmem:[%s2553_s2 + $0x6c] sm:$0xf0]  ;;  %v1654_v40 = vld [vmem:[%s2553_s2 + $0x80] sm:$0xf]  ;;  %v2019_v42 = vor.u32 %v1730_v34, %v1592_v33 }
   0xb   :  { %340 = vmatpush.bf16.msra.mxu1 %v1974_v28  ;;  %v1737_v41 = vld [vmem:[%s2553_s2 + $0x88] sm:$0xf0]  ;;  %v1584_v43 = vld [vmem:[%s2553_s2 + $0x30] sm:$0xf]  ;;  %v1727_v44 = vld [vmem:[%s2553_s2 + $0x38] sm:$0xf0]  ;;  %v2028_v45 = vor.u32 %v1732_v37, %v1602_v38 }
   0xc   :  { %v1729_v46 = vld [vmem:[%s2553_s2 + $0x4c] sm:$0xf]  ;;  %v1594_v47 = vld [vmem:[%s2553_s2 + $0x54] sm:$0xf0]  ;;  %v2037_v48 = vor.u32 %v1737_v41, %v1654_v40  ;;  %v2041_v49 = vor.u32 %v1727_v44, %v1584_v43  ;;  %v1724_v51 = vld [vmem:[%s2553_s2 + $0x20] sm:$0xf0] }
   0xd   :  { %225 = vmatpush.bf16.msra.mxu3 %v1951_v20  ;;  %237 = vmatpush.bf16.msrb.mxu0 %v1960_v23  ;;  %v1576_v50 = vld [vmem:[%s2553_s2 + $0x18] sm:$0xf]  ;;  %v2050_v52 = vor.u32 %v1729_v46, %v1594_v47  ;;  %v1205_v53 = vsel %vm1204_vm1, 1, %v1847_v0  ;;  %v1726_v54 = vld [vmem:[%s2553_s2 + $0x34] sm:$0xf]  ;;  %v1543_v61 = vsel %vm1542_vm2, 1, %v1847_v0 }
   0xe   :  { %v1586_v55 = vld [vmem:[%s2553_s2 + $0x3c] sm:$0xf0]  ;;  %v2061_v56 = vor.u32 %v1724_v51, %v1576_v50  ;;  %v1721_v58 = vld [vmem:[%s2553_s2 + $0x8] sm:$0xf0]  ;;  %v1723_v1 = vld [vmem:[%s2553_s2 + $0x1c] sm:$0xf] }
   0xf   :  { %341 = vmatpush.bf16.msra.mxu1 %v2010_v39  ;;  %v1568_v57 = vld [vmem:[%s2553_s2] sm:$0xf]  ;;  %v2070_v59 = vor.u32 %v1726_v54, %v1586_v55  ;;  %v2089_v63 = vld [vmem:[%s2554_s1 + $0x8] sm:$0xff]  ;;  %v1734_v6 = vld [vmem:[%s2553_s2 + $0x70] sm:$0xf0]  ;;  %vm360_vm3 = vcmp.gt.s32.totalorder %v1897_v3, 0 }
  0x10   :  { %v2074_v60 = vor.u32 %v1721_v58, %v1568_v57  ;;  %v1578_v2 = vld [vmem:[%s2553_s2 + $0x24] sm:$0xf0]  ;;  %117 = vmatpush.msra.mxu2 %v2089_v63  ;;  %v1720_v12 = vld [vmem:[%s2553_s2 + $0x4] sm:$0xf]  ;;  %v1570_v14 = vld [vmem:[%s2553_s2 + $0xc] sm:$0xf0] }
  0x11   :  { %226 = vmatpush.bf16.msra.mxu3 %v1988_v32  ;;  %238 = vmatpush.bf16.msrb.mxu0 %v1998_v35  ;;  %v2098_v4 = vor.u32 %v1723_v1, %v1578_v2  ;;  %v1650_v5 = vld [vmem:[%s2553_s2 + $0x68] sm:$0xf]  ;;  %v1646_v16 = vld [vmem:[%s2553_s2 + $0x50] sm:$0xf]  ;;  %v1731_v18 = vld [vmem:[%s2553_s2 + $0x58] sm:$0xf0] }
  0x12   :  { %700 = vperm.xlu0 %1756, %v698_v15   ;;  %v2106_v8 = vor.u32 %v1734_v6, %v1650_v5  ;;  %v2111_v10 = vld [vmem:[%s2554_s1 + $0x28] sm:$0xff]  ;;  %v2121_v15 = vor.u32 %v1720_v12, %v1570_v14  ;;  %v2130_v19 = vor.u32 %v1731_v18, %v1646_v16  ;;  %v2138_v21 = vld [vmem:[%s2554_s1 + $0x10] sm:$0xff]  ;;  %v1642_v22 = vld [vmem:[%s2553_s2 + $0x38] sm:$0xf]  ;;  %v361_v37 = vsel %vm360_vm3, 1, %v1847_v0 }
  0x13   :  { %342 = vmatpush.bf16.msra.mxu1 %v2037_v48  ;;  %136 = vmatpush.msrb.mxu2 %v2111_v10  ;;  %v1728_v24 = vld [vmem:[%s2553_s2 + $0x40] sm:$0xf0]  ;;  %v1638_v26 = vld [vmem:[%s2553_s2 + $0x20] sm:$0xf]  ;;  %v1725_v27 = vld [vmem:[%s2553_s2 + $0x28] sm:$0xf0] }
  0x14   :  { %v2148_v25 = vor.u32 %v1728_v24, %v1642_v22  ;;  %v2158_v29 = vor.u32 %v1725_v27, %v1638_v26  ;;  %v1634_v30 = vld [vmem:[%s2553_s2 + $0x8] sm:$0xf]  ;;  %v1722_v33 = vld [vmem:[%s2553_s2 + $0x10] sm:$0xf0]  ;;  %363 = vperm.xlu1 %1757, %v361_v37   ;;  %v1849_v41 = vmov 0.0   ;;  %vm528_vm6 = vcmp.gt.s32.totalorder %v1897_v3, 1 }
  0x15   :  { %227 = vmatpush.bf16.msra.mxu3 %v2019_v42  ;;  %239 = vmatpush.bf16.msrb.mxu0 %v2028_v45  ;;  %v2168_v34 = vor.u32 %v1722_v33, %v1634_v30  ;;  %v529_v44 = vsel %vm528_vm6, 1, %v1847_v0  ;;  %v1688_v46 = vld [vmem:[%s2551_s0 + $0x20] sm:$0xff]  ;;  %vm1035_vm8 = vcmp.gt.s32.totalorder %v1897_v3, 4  ;;  %v1672_v24 = vld [vmem:[%s2551_s0 + $0x10] sm:$0xff]  ;;  %vm866_vm13 = vcmp.gt.s32.totalorder %v1897_v3, 3 }
  0x16   :  { %137 = vmatpush.msrb.mxu2 %v2138_v21  ;;  %v1036_v51 = vsel %vm1035_vm8, 1, %v1847_v0  ;;  %541 = vperm.xlu2 %1758, %v1672_v24   ;;  %vm1373_vm3 = vcmp.gt.s32.totalorder %v1897_v3, 6 }
  0x17   :  { %343 = vmatpush.bf16.msra.mxu1 %v2106_v8 }
  0x19   :  { %228 = vmatpush.bf16.msra.mxu3 %v2041_v49  ;;  %240 = vmatpush.bf16.msrb.mxu0 %v2050_v52 }
  0x1a   :  { %1048 = vperm.xlu0 %1756, %v1696_v36   ;;  %v67_v36 = vlaneseq }
  0x1b   :  { %344 = vmatpush.bf16.msra.mxu1 %v2130_v19 }
  0x1c   :  { %v2181_v38 = vand.u32 127, %v67_v36  ;;  %531 = vperm.xlu1 %1757, %v529_v44   ;;  %v2251_v36 = vld [vmem:[%s2555_s3] ss:$0 sm:$0xff]  ;;  %v1680_v44 = vld [vmem:[%s2551_s0 + $0x18] sm:$0xff] }
  0x1d   :  { %229 = vmatpush.bf16.msra.mxu3 %v2061_v56  ;;  %241 = vmatpush.bf16.msrb.mxu0 %v2070_v59 }
  0x1e   :  { %710 = vperm.xlu2 %1758, %v1680_v44  }
  0x1f   :  { %345 = vmatpush.bf16.msra.mxu1 %v2148_v25 }
  0x21   :  { %230 = vmatpush.bf16.msra.mxu3 %v2074_v60  ;;  %242 = vmatpush.bf16.msrb.mxu0 %v2098_v4 }
  0x22   :  { %1207 = vperm.xlu0 %1756, %v1205_v53   ;;  %v1712_v53 = vld [vmem:[%s2551_s0 + $0x38] sm:$0xff] }
  0x23   :  { %346 = vmatpush.bf16.msra.mxu1 %v2158_v29 }
  0x24   :  { %231 = vmatmul.bf16.vlgmr.msra.gmra.mxu3 %v1848_v62  ;;  %879 = vperm.xlu1 %1757, %v1688_v46  }
  0x25   :  { %454 = vmatpush.bf16.msrb.mxu3 %v1942_v17  ;;  %243 = vmatpush.bf16.msrb.mxu0 %v2121_v15 }
  0x27   :  { %347 = vmatpush.bf16.msra.mxu1 %v2168_v34 }
  0x29   :  { %455 = vmatpush.bf16.msrb.mxu3 %v1960_v23 }
  0x2a   :  { %1545 = vperm.xlu0 %1756, %v1543_v61   ;;  %348 = vmatmul.bf16.vlgmr.msra.gmra.mxu1 %v1848_v62 }
  0x2b   :  { %563 = vmatpush.msrb.mxu1 %v1923_v11 }
  0x2c   :  { %1038 = vperm.xlu1 %1757, %v1036_v51  }
  0x2d   :  { %456 = vmatpush.bf16.msrb.mxu3 %v1998_v35  ;;  %564 = vmatpush.msrb.mxu1 %v1932_v13 }
  0x2f   :  { %583 = vmatpush.msra.mxu1 %v1985_v31 }
  0x31   :  { %457 = vmatpush.bf16.msrb.mxu3 %v2028_v45  ;;  %584 = vmatpush.msra.mxu1 %v2089_v63 }
  0x34   :  { %1386 = vperm.xlu1 %1757, %v1712_v53  }
  0x35   :  { %458 = vmatpush.bf16.msrb.mxu3 %v2050_v52 }
  0x39   :  { %459 = vmatpush.bf16.msrb.mxu3 %v2070_v59 }
  0x3d   :  { %460 = vmatpush.bf16.msrb.mxu3 %v2098_v4 }
  0x41   :  { %461 = vmatpush.bf16.msrb.mxu3 %v2121_v15 }
  0x45   :  { %623 = vmatpush.bf16.msra.mxu3 %v1942_v17 }
  0x49   :  { %624 = vmatpush.bf16.msra.mxu3 %v1960_v23 }
  0x4d   :  { %625 = vmatpush.bf16.msra.mxu3 %v1998_v35 }
  0x51   :  { %626 = vmatpush.bf16.msra.mxu3 %v2028_v45 }
  0x55   :  { %627 = vmatpush.bf16.msra.mxu3 %v2050_v52 }
  0x59   :  { %628 = vmatpush.bf16.msra.mxu3 %v2070_v59 }
  0x5d   :  { %629 = vmatpush.bf16.msra.mxu3 %v2098_v4 }
  0x61   :  { %630 = vmatpush.bf16.msra.mxu3 %v2121_v15 }
  0x70   :  { %v542_v44 = vpop.permute.xlu2 %541 }
  0x71   :  { %vm543_vm6 = vcmp.eq.s32.totalorder %v542_v44, %v2181_v38 }
  0x74   :  { %v74_v40 = vpop.permute.xlu0 %73 }
  0x75   :  { %vm75_vm5 = vcmp.eq.s32.totalorder %v74_v40, %v2181_v38 }
  0x76   :  { %v1562_v43 = vsel %vm75_vm5, 1.0, %v1849_v41 }
  0x77   :  { %1563 = vmatmul.msk.f32.vlgmr.msra.gmra.mxu0 %vm78_vm4, %v1562_v43  ;;  %1564 = vmatmul.msk.f32.vlgmr.msra.gmra.mxu2 %vm78_vm4, %v1562_v43 }
  0x78   :  { %394 = vmatpush.msra.mxu2 %v1923_v11  ;;  %507 = vmatpush.bf16.msra.mxu0 %v1974_v28 }
  0x7a   :  { %395 = vmatpush.msra.mxu2 %v1932_v13 }
  0x7c   :  { %508 = vmatpush.bf16.msra.mxu0 %v2010_v39  ;;  %v373_v47 = vpop.permute.xlu0 %372 }
  0x7d   :  { %vm374_vm7 = vcmp.eq.s32.totalorder %v373_v47, %v2181_v38 }
  0x7e   :  { %v1665_v50 = vsel %vm374_vm7, 1.0, %v1849_v41 }
  0x7f   :  { %1565 = vmatmul.msk.f32.vlgmr.msrb.gmra.mxu2 %vm78_vm4, %v1562_v43  ;;  %244 = vmatmul.bf16.vlgmr.msrb.gmra.mxu0 %v1848_v62 }
  0x80   :  { %414 = vmatpush.msrb.mxu2 %v1985_v31  ;;  %509 = vmatpush.bf16.msra.mxu0 %v2037_v48 }
  0x82   :  { %415 = vmatpush.msrb.mxu2 %v2089_v63 }
  0x84   :  { %510 = vmatpush.bf16.msra.mxu0 %v2106_v8 }
  0x87   :  { %1666 = vmatmul.msk.f32.vlgmr.msra.gmra.mxu2 %vm78_vm4, %v1665_v50 }
  0x88   :  { %434 = vmatpush.msra.mxu2 %v2111_v10  ;;  %511 = vmatpush.bf16.msra.mxu0 %v2130_v19 }
  0x8a   :  { %435 = vmatpush.msra.mxu2 %v2138_v21 }
  0x8c   :  { %512 = vmatpush.bf16.msra.mxu0 %v2148_v25 }
  0x8f   :  { %1667 = vmatmul.msk.f32.vlgmr.msrb.gmra.mxu2 %vm78_vm4, %v1665_v50 }
  0x90   :  { %441 = vmatpush.bf16.msrb.mxu2 %v1908_v7  ;;  %513 = vmatpush.bf16.msra.mxu0 %v2158_v29 }
  0x94   :  { %442 = vmatpush.bf16.msrb.mxu2 %v1915_v9  ;;  %514 = vmatpush.bf16.msra.mxu0 %v2168_v34 }
  0x97   :  { %1668 = vmatmul.msk.f32.vlgmr.msra.gmra.mxu2 %vm78_vm4, %v1665_v50 }
  0x98   :  { %676 = vmatpush.bf16.msrb.mxu0 %v1974_v28  ;;  %443 = vmatpush.bf16.msrb.mxu2 %v1951_v20 }
  0x9c   :  { %677 = vmatpush.bf16.msrb.mxu0 %v2010_v39  ;;  %444 = vmatpush.bf16.msrb.mxu2 %v1988_v32 }
  0xa0   :  { %678 = vmatpush.bf16.msrb.mxu0 %v2037_v48  ;;  %445 = vmatpush.bf16.msrb.mxu2 %v2019_v42 }
  0xa4   :  { %679 = vmatpush.bf16.msrb.mxu0 %v2106_v8  ;;  %446 = vmatpush.bf16.msrb.mxu2 %v2041_v49 }
  0xa7   :  { %v232_v54 = vpop.f32.mrf.mxu3  ;;  %v349_v57 = vpop.f32.mrf.mxu1 }
  0xa8   :  { %680 = vmatpush.bf16.msrb.mxu0 %v2130_v19  ;;  %447 = vmatpush.bf16.msrb.mxu2 %v2061_v56  ;;  %v350_v47 = vadd.f32 %v2251_v36, %v349_v57 }
  0xac   :  { %681 = vmatpush.bf16.msrb.mxu0 %v2148_v25  ;;  %448 = vmatpush.bf16.msrb.mxu2 %v2074_v60 }
  0xaf   :  { %v234_v55 = vpop.f32.mrf.mxu3  ;;  %v351_v58 = vpop.f32.mrf.mxu1 }
  0xb0   :  { %610 = vmatpush.bf16.msra.mxu2 %v1908_v7  ;;  %682 = vmatpush.bf16.msrb.mxu0 %v2158_v29 }
  0xb4   :  { %611 = vmatpush.bf16.msra.mxu2 %v1915_v9  ;;  %683 = vmatpush.bf16.msrb.mxu0 %v2168_v34 }
  0xb8   :  { %612 = vmatpush.bf16.msra.mxu2 %v1951_v20 }
  0xbc   :  { %613 = vmatpush.bf16.msra.mxu2 %v1988_v32 }
  0xc0   :  { %614 = vmatpush.bf16.msra.mxu2 %v2019_v42 }
  0xc4   :  { %615 = vmatpush.bf16.msra.mxu2 %v2041_v49 }
  0xc8   :  { %616 = vmatpush.bf16.msra.mxu2 %v2061_v56 }
  0xcc   :  { %617 = vmatpush.bf16.msra.mxu2 %v2074_v60 }
  0xf4   :  { %v99_v61 = vpop.f32.mrf.mxu0 }
  0xf5   :  { %v249_v62 = vadd.f32 %v232_v54, %v99_v61 }
  0xf7   :  { %v1630_v1 = vmul.f32 -1.442695, %v249_v62 }
  0xf9   :  { %1760 = vpow2.f32 %v1630_v1 }
  0xfa   :  { %v119_v2 = vpop.f32.mrf.mxu2 }
  0xfc   :  { %v245_v5 = vpop.f32.mrf.mxu0 }
  0xfd   :  { %v269_v6 = vadd.f32 %v245_v5, %v119_v2  ;;  %v867_v5 = vsel %vm866_vm13, 1, %v1847_v0 }
  0xfe   :  { %869 = vperm.xlu2 %1758, %v867_v5  }
  0xff   :  { %v1761_v12 = vpop.eup %1760  ;;  %v1631_v14 = vmul.f32 -1.442695, %v269_v6 }
 0x100   :  { %v253_v16 = vadd.f32 1.0, %v1761_v12 }
 0x101   :  { %1762 = vpow2.f32 %v1631_v14 }
 0x102   :  { %1764 = vrcp.f32 %v253_v16  ;;  %v265_v37 = vand.u32 2147483648, %v253_v16  ;;  %v263_v43 = vand.u32 2147483647, %v253_v16  ;;  %vm259_vm10 = vweird.f32 %v253_v16  ;;  %v139_v62 = vpop.f32.mrf.mxu2 }
 0x104   :  { %v247_v18 = vpop.f32.mrf.mxu0  ;;  %v266_v51 = vor.u32 1.1754944e-38, %v265_v37  ;;  %vm264_vm12 = vcmp.eq.f32.partialorder %v263_v43, 8.507059e+37  ;;  %v1374_v43 = vsel %vm1373_vm3, 1, %v1847_v0 }
 0x107   :  { %v1763_v22 = vpop.eup %1762 }
 0x108   :  { %v1765_v26 = vpop.eup %1764  ;;  %v273_v27 = vadd.f32 1.0, %v1763_v22  ;;  %v1704_v22 = vld [vmem:[%s2551_s0 + $0x30] sm:$0xff] }
 0x109   :  { %v255_v30 = vmul.f32 %v1765_v26, %v253_v16  ;;  %vm260_vm9 = vweird.f32 %v1765_v26  ;;  %1217 = vperm.xlu2 %1758, %v1704_v22  }
 0x10a   :  { %1766 = vrcp.f32 %v273_v27  ;;  %vm261_vm11 = vmor %vm259_vm10, %vm260_vm9  ;;  %v285_v57 = vand.u32 2147483648, %v273_v27  ;;  %vm279_vm15 = vweird.f32 %v273_v27  ;;  %v283_v12 = vand.u32 2147483647, %v273_v27  ;;  %v397_v0 = vpop.f32.mrf.mxu2 }
 0x10b   :  { %v256_v33 = vsub.f32 1.0, %v255_v30 }
 0x10c   :  { %v286_v18 = vor.u32 1.1754944e-38, %v285_v57  ;;  %vm284_vm1 = vcmp.eq.f32.partialorder %v283_v12, 8.507059e+37 }
 0x10d   :  { %v257_v40 = vmul.f32 %v1765_v26, %v256_v33 }
 0x10f   :  { %v258_v46 = vadd.f32 %v1765_v26, %v257_v40 }
 0x110   :  { %v1767_v50 = vpop.eup %1766 }
 0x111   :  { %v275_v53 = vmul.f32 %v1767_v50, %v273_v27  ;;  %v262_v54 = vsel %vm261_vm11, %v1765_v26, %v258_v46  ;;  %vm280_vm14 = vweird.f32 %v1767_v50  ;;  %v364_v26 = vpop.permute.xlu1 %363  ;;  %1376 = vperm.xlu2 %1758, %v1374_v43   ;;  %v1673_v46 = vsel %vm543_vm6, 1.0, %v1849_v41 }
 0x112   :  { %v267_v55 = vsel %vm264_vm12, %v266_v51, %v262_v54  ;;  %vm281_vm0 = vmor %vm279_vm15, %vm280_vm14  ;;  %vm365_vm2 = vcmp.eq.s32.totalorder %v364_v26, 1  ;;  %v417_v3 = vpop.f32.mrf.mxu2  ;;  %1674 = vmatmul.msk.f32.vlgmr.msrb.gmra.mxu1 %vm78_vm4, %v1673_v46 }
 0x113   :  { %v276_v58 = vsub.f32 1.0, %v275_v53  ;;  %v353_v61 = vmul.f32 %v350_v47, %v267_v55  ;;  %vm1744_vm5 = vmpackc.low %vm365_vm2, %vm365_vm2  ;;  %603 = vmatpush.msrb.mxu1 %v2111_v10 }
 0x115   :  { %v277_v1 = vmul.f32 %v1767_v50, %v276_v58  ;;  %v354_v2 = vadd.f32 %v353_v61, %v139_v62  ;;  %604 = vmatpush.msrb.mxu1 %v2138_v21 }
 0x117   :  { %1768 = vtanh.f32 %v354_v2  ;;  %v278_v6 = vadd.f32 %v1767_v50, %v277_v1  ;;  %v711_v1 = vpop.permute.xlu2 %710 }
 0x118   :  { %vm712_vm7 = vcmp.eq.s32.totalorder %v711_v1, %v2181_v38 }
 0x119   :  { %v282_v14 = vsel %vm281_vm0, %v1767_v50, %v278_v6  ;;  %v1681_v2 = vsel %vm712_vm7, 1.0, %v1849_v41 }
 0x11a   :  { %v287_v30 = vsel %vm284_vm1, %v286_v18, %v282_v14  ;;  %v437_v47 = vpop.f32.mrf.mxu2  ;;  %1675 = vmatmul.msk.f32.vlgmr.msra.gmra.mxu1 %vm78_vm4, %v1673_v46 }
 0x11b   :  { %732 = vmatpush.msra.mxu1 %v1923_v11 }
 0x11d   :  { %v1769_v16 = vpop.eup %1768  ;;  %733 = vmatpush.msra.mxu1 %v1932_v13 }
 0x11e   :  { %v356_v24 = vsub.f32 0.0, %v1769_v16 }
 0x120   :  { %v357_v33 = vmul.f32 %v356_v24, %v287_v30 }
 0x122   :  { %v358_v37 = vadd.f32 %v1769_v16, %v357_v33  ;;  %1676 = vmatmul.msk.f32.vlgmr.msrb.gmra.mxu1 %vm78_vm4, %v1673_v46 }
 0x123   :  { %752 = vmatpush.msrb.mxu1 %v1985_v31 }
 0x124   :  { %v1745_v27 = vpack.c.bf16 %v358_v37, %v358_v37  ;;  %v2263_v40 = vsel %vm365_vm2, %v358_v37, 0.0 }
 0x125   :  { %368 = vst [vmem:[%s2556_s5] sm:$0xff] %v2263_v40  ;;  %753 = vmatpush.msrb.mxu1 %v2089_v63 }
 0x126   :  { %1746 = vmatmul.msk.bf16.vlgmr.msrb.gmra.mxu2 %vm1744_vm5, %v1745_v27  ;;  %1749 = vmatmul.msk.bf16.vlgmr.msrb.gmra.mxu3 %vm1744_vm5, %v1745_v27 }
 0x127   :  { %1752 = vmatmul.msk.bf16.vlgmr.msra.gmra.mxu0 %vm1744_vm5, %v1745_v27  ;;  %792 = vmatpush.bf16.msrb.mxu2 %v1942_v17 }
 0x128   :  { %921 = vmatpush.msra.mxu0 %v1985_v31  ;;  %845 = vmatpush.bf16.msrb.mxu3 %v1974_v28 }
 0x12a   :  { %922 = vmatpush.msra.mxu0 %v2089_v63  ;;  %1682 = vmatmul.msk.f32.vlgmr.msra.gmra.mxu1 %vm78_vm4, %v1681_v2 }
 0x12b   :  { %793 = vmatpush.bf16.msrb.mxu2 %v1960_v23  ;;  %772 = vmatpush.msra.mxu1 %v2111_v10 }
 0x12c   :  { %846 = vmatpush.bf16.msrb.mxu3 %v2010_v39 }
 0x12d   :  { %773 = vmatpush.msra.mxu1 %v2138_v21 }
 0x12f   :  { %794 = vmatpush.bf16.msrb.mxu2 %v1998_v35 }
 0x130   :  { %847 = vmatpush.bf16.msrb.mxu3 %v2037_v48 }
 0x132   :  { %1683 = vmatmul.msk.f32.vlgmr.msrb.gmra.mxu1 %vm78_vm4, %v1681_v2 }
 0x133   :  { %795 = vmatpush.bf16.msrb.mxu2 %v2028_v45  ;;  %779 = vmatpush.bf16.msrb.mxu1 %v1908_v7 }
 0x134   :  { %848 = vmatpush.bf16.msrb.mxu3 %v2106_v8 }
 0x137   :  { %796 = vmatpush.bf16.msrb.mxu2 %v2050_v52  ;;  %780 = vmatpush.bf16.msrb.mxu1 %v1915_v9 }
 0x138   :  { %849 = vmatpush.bf16.msrb.mxu3 %v2130_v19 }
 0x13a   :  { %1684 = vmatmul.msk.f32.vlgmr.msra.gmra.mxu1 %vm78_vm4, %v1681_v2 }
 0x13b   :  { %797 = vmatpush.bf16.msrb.mxu2 %v2070_v59  ;;  %781 = vmatpush.bf16.msrb.mxu1 %v1951_v20 }
 0x13c   :  { %850 = vmatpush.bf16.msrb.mxu3 %v2148_v25 }
 0x13f   :  { %798 = vmatpush.bf16.msrb.mxu2 %v2098_v4  ;;  %782 = vmatpush.bf16.msrb.mxu1 %v1988_v32 }
 0x140   :  { %851 = vmatpush.bf16.msrb.mxu3 %v2158_v29 }
 0x143   :  { %799 = vmatpush.bf16.msrb.mxu2 %v2121_v15  ;;  %783 = vmatpush.bf16.msrb.mxu1 %v2019_v42 }
 0x144   :  { %852 = vmatpush.bf16.msrb.mxu3 %v2168_v34 }
 0x147   :  { %784 = vmatpush.bf16.msrb.mxu1 %v2041_v49 }
 0x14b   :  { %785 = vmatpush.bf16.msrb.mxu1 %v2061_v56 }
 0x14f   :  { %786 = vmatpush.bf16.msrb.mxu1 %v2074_v60 }
 0x153   :  { %948 = vmatpush.bf16.msra.mxu1 %v1908_v7 }
 0x157   :  { %949 = vmatpush.bf16.msra.mxu1 %v1915_v9 }
 0x15b   :  { %950 = vmatpush.bf16.msra.mxu1 %v1951_v20 }
 0x15f   :  { %951 = vmatpush.bf16.msra.mxu1 %v1988_v32 }
 0x163   :  { %952 = vmatpush.bf16.msra.mxu1 %v2019_v42 }
 0x167   :  { %953 = vmatpush.bf16.msra.mxu1 %v2041_v49 }
 0x16b   :  { %954 = vmatpush.bf16.msra.mxu1 %v2061_v56 }
 0x16f   :  { %955 = vmatpush.bf16.msra.mxu1 %v2074_v60 }
 0x1a4   :  { %v516_v50 = vpop.f32.mrf.mxu0 }
 0x1a5   :  { %v517_v44 = vadd.f32 %v2251_v36, %v516_v50 }
 0x1a9   :  { %v450_v51 = vpop.f32.mrf.mxu2  ;;  %v463_v53 = vpop.f32.mrf.mxu3 }
 0x1aa   :  { %v467_v54 = vadd.f32 %v450_v51, %v397_v0  ;;  %v487_v55 = vadd.f32 %v463_v53, %v417_v3 }
 0x1ac   :  { %v1669_v58 = vmul.f32 -1.442695, %v467_v54  ;;  %v1670_v61 = vmul.f32 -1.442695, %v487_v55  ;;  %v518_v62 = vpop.f32.mrf.mxu0 }
 0x1ae   :  { %1770 = vpow2.f32 %v1669_v58 }
 0x1af   :  { %1772 = vpow2.f32 %v1670_v61 }
 0x1b1   :  { %v452_v5 = vpop.f32.mrf.mxu2  ;;  %v465_v6 = vpop.f32.mrf.mxu3 }
 0x1b4   :  { %v1771_v57 = vpop.eup %1770 }
 0x1b5   :  { %v1773_v12 = vpop.eup %1772  ;;  %v471_v14 = vadd.f32 1.0, %v1771_v57  ;;  %v532_v57 = vpop.permute.xlu1 %531 }
 0x1b6   :  { %v491_v16 = vadd.f32 1.0, %v1773_v12  ;;  %vm533_vm0 = vcmp.eq.s32.totalorder %v532_v57, 1 }
 0x1b7   :  { %1774 = vrcp.f32 %v471_v14  ;;  %v483_v30 = vand.u32 2147483648, %v471_v14  ;;  %v481_v27 = vand.u32 2147483647, %v471_v14  ;;  %vm477_vm9 = vweird.f32 %v471_v14 }
 0x1b8   :  { %1776 = vrcp.f32 %v491_v16  ;;  %v503_v61 = vand.u32 2147483648, %v491_v16  ;;  %vm497_vm13 = vweird.f32 %v491_v16  ;;  %v501_v62 = vand.u32 2147483647, %v491_v16 }
 0x1b9   :  { %v484_v0 = vor.u32 1.1754944e-38, %v483_v30  ;;  %vm482_vm11 = vcmp.eq.f32.partialorder %v481_v27, 8.507059e+37 }
 0x1ba   :  { %v504_v2 = vor.u32 1.1754944e-38, %v503_v61  ;;  %vm502_vm15 = vcmp.eq.f32.partialorder %v501_v62, 8.507059e+37 }
 0x1bd   :  { %v1775_v18 = vpop.eup %1774 }
 0x1be   :  { %v1777_v22 = vpop.eup %1776  ;;  %v473_v24 = vmul.f32 %v1775_v18, %v471_v14  ;;  %vm478_vm8 = vweird.f32 %v1775_v18 }
 0x1bf   :  { %v493_v33 = vmul.f32 %v1777_v22, %v491_v16  ;;  %vm479_vm10 = vmor %vm477_vm9, %vm478_vm8  ;;  %vm498_vm12 = vweird.f32 %v1777_v22 }
 0x1c0   :  { %v474_v26 = vsub.f32 1.0, %v473_v24  ;;  %vm499_vm14 = vmor %vm497_vm13, %vm498_vm12 }
 0x1c1   :  { %v494_v3 = vsub.f32 1.0, %v493_v33 }
 0x1c2   :  { %v475_v37 = vmul.f32 %v1775_v18, %v474_v26 }
 0x1c3   :  { %v495_v54 = vmul.f32 %v1777_v22, %v494_v3 }
 0x1c4   :  { %v476_v43 = vadd.f32 %v1775_v18, %v475_v37 }
 0x1c5   :  { %v496_v58 = vadd.f32 %v1777_v22, %v495_v54 }
 0x1c6   :  { %v480_v46 = vsel %vm479_vm10, %v1775_v18, %v476_v43 }
 0x1c7   :  { %v485_v51 = vsel %vm482_vm11, %v484_v0, %v480_v46  ;;  %v500_v50 = vsel %vm499_vm14, %v1777_v22, %v496_v58  ;;  %v2338_v22 = vpop.permute.xlu0 %700 }
 0x1c8   :  { %v520_v53 = vmul.f32 %v517_v44, %v485_v51  ;;  %v505_v6 = vsel %vm502_vm15, %v504_v2, %v500_v50  ;;  %vm702_vm12 = vcmp.eq.s32.totalorder %v2338_v22, 1  ;;  %v2396_v22 = vld [vmem:[%s2554_s1 + $0x18] sm:$0xff] }
 0x1ca   :  { %v521_v55 = vadd.f32 %v520_v53, %v437_v47 }
 0x1cc   :  { %1778 = vtanh.f32 %v521_v55 }
 0x1cf   :  { %v1049_v26 = vpop.permute.xlu0 %1048 }
 0x1d0   :  { %vm1050_vm2 = vcmp.eq.s32.totalorder %v1049_v26, %v2181_v38 }
 0x1d2   :  { %v1779_v1 = vpop.eup %1778 }
 0x1d3   :  { %v523_v5 = vsub.f32 %v2263_v40, %v1779_v1 }
 0x1d5   :  { %v524_v47 = vmul.f32 %v523_v5, %v505_v6 }
 0x1d7   :  { %v525_v12 = vadd.f32 %v1779_v1, %v524_v47 }
 0x1d9   :  { %v2317_v14 = vsel %vm533_vm0, %v525_v12, %v2263_v40  ;;  %v535_v16 = vsel %vm533_vm0, %v525_v12, 0.0  ;;  %v880_v40 = vpop.permute.xlu1 %879 }
 0x1da   :  { %1671 = vst [vmem:[%s2556_s5 + $0x8] sm:$0xff] %v535_v16  ;;  %v609_v18 = vpack.c.bf16 %v2317_v14, %v2317_v14  ;;  %vm881_vm1 = vcmp.eq.s32.totalorder %v880_v40, %v2181_v38 }
 0x1db   :  { %v2341_v24 = vsel %vm881_vm1, 1.0, %v1849_v41 }
 0x1dc   :  { %618 = vmatmul.bf16.vlgmr.msra.gmra.mxu2 %v609_v18  ;;  %631 = vmatmul.bf16.vlgmr.msra.gmra.mxu3 %v609_v18 }
 0x1dd   :  { %684 = vmatmul.bf16.vlgmr.msrb.gmra.mxu0 %v609_v18  ;;  %901 = vmatpush.msra.mxu2 %v1923_v11 }
 0x1de   :  { %941 = vmatpush.msrb.mxu0 %v2111_v10  ;;  %1014 = vmatpush.bf16.msra.mxu3 %v1974_v28 }
 0x1df   :  { %902 = vmatpush.msra.mxu2 %v1932_v13 }
 0x1e0   :  { %942 = vmatpush.msrb.mxu0 %v2138_v21 }
 0x1e2   :  { %1015 = vmatpush.bf16.msra.mxu3 %v2010_v39 }
 0x1e6   :  { %1016 = vmatpush.bf16.msra.mxu3 %v2037_v48 }
 0x1ea   :  { %1017 = vmatpush.bf16.msra.mxu3 %v2106_v8 }
 0x1ed   :  { %1691 = vmatmul.msk.f32.vlgmr.msra.gmra.mxu0 %vm78_vm4, %v2341_v24 }
 0x1ee   :  { %1070 = vmatpush.msra.mxu0 %v1923_v11  ;;  %1018 = vmatpush.bf16.msra.mxu3 %v2130_v19  ;;  %v1697_v11 = vsel %vm1050_vm2, 1.0, %v1849_v41 }
 0x1f0   :  { %1071 = vmatpush.msra.mxu0 %v1932_v13  ;;  %v566_v13 = vpop.f32.mrf.mxu1 }
 0x1f2   :  { %1019 = vmatpush.bf16.msra.mxu3 %v2148_v25 }
 0x1f5   :  { %1692 = vmatmul.msk.f32.vlgmr.msrb.gmra.mxu0 %vm78_vm4, %v2341_v24 }
 0x1f6   :  { %1090 = vmatpush.msrb.mxu0 %v1985_v31  ;;  %1020 = vmatpush.bf16.msra.mxu3 %v2158_v29 }
 0x1f8   :  { %1091 = vmatpush.msrb.mxu0 %v2089_v63  ;;  %v586_v63 = vpop.f32.mrf.mxu1 }
 0x1fa   :  { %1021 = vmatpush.bf16.msra.mxu3 %v2168_v34 }
 0x1fd   :  { %1698 = vmatmul.msk.f32.vlgmr.msra.gmra.mxu0 %vm78_vm4, %v1697_v11 }
 0x1fe   :  { %1110 = vmatpush.msra.mxu0 %v2111_v10 }
 0x200   :  { %1111 = vmatpush.msra.mxu0 %v2138_v21  ;;  %v606_v40 = vpop.f32.mrf.mxu1 }
 0x205   :  { %1699 = vmatmul.msk.f32.vlgmr.msrb.gmra.mxu0 %vm78_vm4, %v1697_v11 }
 0x206   :  { %1117 = vmatpush.bf16.msrb.mxu0 %v1908_v7 }
 0x20a   :  { %1118 = vmatpush.bf16.msrb.mxu0 %v1915_v9 }
 0x20d   :  { %1700 = vmatmul.msk.f32.vlgmr.msra.gmra.mxu0 %vm78_vm4, %v1697_v11 }
 0x20e   :  { %1119 = vmatpush.bf16.msrb.mxu0 %v1951_v20 }
 0x212   :  { %1120 = vmatpush.bf16.msrb.mxu0 %v1988_v32 }
 0x216   :  { %1121 = vmatpush.bf16.msrb.mxu0 %v2019_v42 }
 0x21a   :  { %1122 = vmatpush.bf16.msrb.mxu0 %v2041_v49 }
 0x21e   :  { %1123 = vmatpush.bf16.msrb.mxu0 %v2061_v56 }
 0x222   :  { %1124 = vmatpush.bf16.msrb.mxu0 %v2074_v60 }
 0x226   :  { %1286 = vmatpush.bf16.msra.mxu0 %v1908_v7 }
 0x22a   :  { %1287 = vmatpush.bf16.msra.mxu0 %v1915_v9 }
 0x22e   :  { %1288 = vmatpush.bf16.msra.mxu0 %v1951_v20 }
 0x232   :  { %1289 = vmatpush.bf16.msra.mxu0 %v1988_v32 }
 0x236   :  { %1290 = vmatpush.bf16.msra.mxu0 %v2019_v42 }
 0x23a   :  { %1291 = vmatpush.bf16.msra.mxu0 %v2041_v49 }
 0x23e   :  { %1292 = vmatpush.bf16.msra.mxu0 %v2061_v56 }
 0x242   :  { %1293 = vmatpush.bf16.msra.mxu0 %v2074_v60 }
 0x25a   :  { %v685_v31 = vpop.f32.mrf.mxu0 }
 0x25b   :  { %v686_v57 = vadd.f32 %v2251_v36, %v685_v31 }
 0x25f   :  { %v619_v10 = vpop.f32.mrf.mxu2  ;;  %v632_v21 = vpop.f32.mrf.mxu3 }
 0x260   :  { %v636_v30 = vadd.f32 %v619_v10, %v566_v13  ;;  %v656_v33 = vadd.f32 %v632_v21, %v586_v63 }
 0x262   :  { %v1677_v37 = vmul.f32 -1.442695, %v636_v30  ;;  %v1678_v27 = vmul.f32 -1.442695, %v656_v33  ;;  %v687_v43 = vpop.f32.mrf.mxu0 }
 0x264   :  { %1780 = vpow2.f32 %v1677_v37 }
 0x265   :  { %1782 = vpow2.f32 %v1678_v27 }
 0x267   :  { %v621_v0 = vpop.f32.mrf.mxu2  ;;  %v634_v3 = vpop.f32.mrf.mxu3 }
 0x26a   :  { %v1781_v44 = vpop.eup %1780 }
 0x26b   :  { %v1783_v46 = vpop.eup %1782  ;;  %v640_v51 = vadd.f32 1.0, %v1781_v44 }
 0x26c   :  { %v660_v53 = vadd.f32 1.0, %v1783_v46 }
 0x26d   :  { %1784 = vrcp.f32 %v640_v51  ;;  %v652_v62 = vand.u32 2147483648, %v640_v51  ;;  %v650_v2 = vand.u32 2147483647, %v640_v51  ;;  %vm646_vm5 = vweird.f32 %v640_v51 }
 0x26e   :  { %1786 = vrcp.f32 %v660_v53  ;;  %v672_v63 = vand.u32 2147483648, %v660_v53  ;;  %vm666_vm9 = vweird.f32 %v660_v53  ;;  %v670_v10 = vand.u32 2147483647, %v660_v53 }
 0x26f   :  { %v653_v6 = vor.u32 1.1754944e-38, %v652_v62  ;;  %vm651_vm7 = vcmp.eq.f32.partialorder %v650_v2, 8.507059e+37 }
 0x270   :  { %v673_v33 = vor.u32 1.1754944e-38, %v672_v63  ;;  %vm671_vm11 = vcmp.eq.f32.partialorder %v670_v10, 8.507059e+37 }
 0x273   :  { %v1785_v54 = vpop.eup %1784 }
 0x274   :  { %v1787_v55 = vpop.eup %1786  ;;  %v642_v58 = vmul.f32 %v1785_v54, %v640_v51  ;;  %vm647_vm3 = vweird.f32 %v1785_v54 }
 0x275   :  { %v662_v50 = vmul.f32 %v1787_v55, %v660_v53  ;;  %vm648_vm6 = vmor %vm646_vm5, %vm647_vm3  ;;  %vm667_vm8 = vweird.f32 %v1787_v55 }
 0x276   :  { %v643_v61 = vsub.f32 1.0, %v642_v58  ;;  %vm668_vm10 = vmor %vm666_vm9, %vm667_vm8 }
 0x277   :  { %v663_v47 = vsub.f32 1.0, %v662_v50 }
 0x278   :  { %v644_v1 = vmul.f32 %v1785_v54, %v643_v61 }
 0x279   :  { %v664_v26 = vmul.f32 %v1787_v55, %v663_v47 }
 0x27a   :  { %v645_v5 = vadd.f32 %v1785_v54, %v644_v1 }
 0x27b   :  { %v665_v13 = vadd.f32 %v1787_v55, %v664_v26 }
 0x27c   :  { %v649_v12 = vsel %vm648_vm6, %v1785_v54, %v645_v5 }
 0x27d   :  { %v654_v16 = vsel %vm651_vm7, %v653_v6, %v649_v12  ;;  %v669_v21 = vsel %vm668_vm10, %v1787_v55, %v665_v13 }
 0x27e   :  { %v689_v18 = vmul.f32 %v686_v57, %v654_v16  ;;  %v674_v37 = vsel %vm671_vm11, %v673_v33, %v669_v21 }
 0x280   :  { %v690_v11 = vadd.f32 %v689_v18, %v606_v40 }
 0x282   :  { %1788 = vtanh.f32 %v690_v11 }
 0x288   :  { %v1789_v30 = vpop.eup %1788 }
 0x289   :  { %v692_v31 = vsub.f32 %v2317_v14, %v1789_v30 }
 0x28b   :  { %v693_v27 = vmul.f32 %v692_v31, %v674_v37 }
 0x28d   :  { %v694_v43 = vadd.f32 %v1789_v30, %v693_v27 }
 0x28f   :  { %v2385_v0 = vsel %vm702_vm12, %v694_v43, %v2317_v14  ;;  %v704_v3 = vsel %vm702_vm12, %v694_v43, 0.0  ;;  %v2403_v14 = vld [vmem:[%s2554_s1] sm:$0xff] }
 0x290   :  { %1679 = vst [vmem:[%s2556_s5 + $0x10] sm:$0xff] %v704_v3  ;;  %v778_v44 = vpack.c.bf16 %v2385_v0, %v2385_v0 }
 0x292   :  { %787 = vmatmul.bf16.vlgmr.msrb.gmra.mxu1 %v778_v44  ;;  %800 = vmatmul.bf16.vlgmr.msrb.gmra.mxu2 %v778_v44 }
 0x293   :  { %853 = vmatmul.bf16.vlgmr.msrb.gmra.mxu3 %v778_v44  ;;  %961 = vmatpush.bf16.msrb.mxu2 %v1942_v17 }
 0x294   :  { %1239 = vmatpush.msrb.mxu3 %v2396_v22  ;;  %1130 = vmatpush.bf16.msrb.mxu1 %v1942_v17 }
 0x296   :  { %1240 = vmatpush.msrb.mxu3 %v2403_v14 }
 0x297   :  { %962 = vmatpush.bf16.msrb.mxu2 %v1960_v23 }
 0x298   :  { %1131 = vmatpush.bf16.msrb.mxu1 %v1960_v23 }
 0x29b   :  { %963 = vmatpush.bf16.msrb.mxu2 %v1998_v35 }
 0x29c   :  { %1132 = vmatpush.bf16.msrb.mxu1 %v1998_v35 }
 0x29f   :  { %964 = vmatpush.bf16.msrb.mxu2 %v2028_v45 }
 0x2a0   :  { %1133 = vmatpush.bf16.msrb.mxu1 %v2028_v45 }
 0x2a2   :  { %1690 = vmatmul.msk.f32.vlgmr.msra.gmra.mxu2 %vm78_vm4, %v2341_v24  ;;  %v735_v24 = vpop.f32.mrf.mxu1 }
 0x2a3   :  { %965 = vmatpush.bf16.msrb.mxu2 %v2050_v52 }
 0x2a4   :  { %1134 = vmatpush.bf16.msrb.mxu1 %v2050_v52 }
 0x2a7   :  { %966 = vmatpush.bf16.msrb.mxu2 %v2070_v59 }
 0x2a8   :  { %1135 = vmatpush.bf16.msrb.mxu1 %v2070_v59 }
 0x2aa   :  { %v755_v46 = vpop.f32.mrf.mxu1 }
 0x2ab   :  { %967 = vmatpush.bf16.msrb.mxu2 %v2098_v4 }
 0x2ac   :  { %1136 = vmatpush.bf16.msrb.mxu1 %v2098_v4 }
 0x2af   :  { %968 = vmatpush.bf16.msrb.mxu2 %v2121_v15 }
 0x2b0   :  { %1137 = vmatpush.bf16.msrb.mxu1 %v2121_v15 }
 0x2b2   :  { %v775_v51 = vpop.f32.mrf.mxu1 }
 0x2b3   :  { %1183 = vmatpush.bf16.msra.mxu2 %v1974_v28 }
 0x2b7   :  { %1184 = vmatpush.bf16.msra.mxu2 %v2010_v39 }
 0x2bb   :  { %1185 = vmatpush.bf16.msra.mxu2 %v2037_v48 }
 0x2bf   :  { %1186 = vmatpush.bf16.msra.mxu2 %v2106_v8 }
 0x2c3   :  { %1187 = vmatpush.bf16.msra.mxu2 %v2130_v19 }
 0x2c7   :  { %1188 = vmatpush.bf16.msra.mxu2 %v2148_v25 }
 0x2cb   :  { %1189 = vmatpush.bf16.msra.mxu2 %v2158_v29 }
 0x2cf   :  { %1190 = vmatpush.bf16.msra.mxu2 %v2168_v34 }
 0x30f   :  { %v788_v53 = vpop.f32.mrf.mxu1 }
 0x310   :  { %v805_v54 = vadd.f32 %v788_v53, %v735_v24 }
 0x312   :  { %v1685_v55 = vmul.f32 -1.442695, %v805_v54 }
 0x314   :  { %1790 = vpow2.f32 %v1685_v55 }
 0x315   :  { %v801_v58 = vpop.f32.mrf.mxu2 }
 0x316   :  { %v825_v61 = vadd.f32 %v801_v58, %v755_v46  ;;  %v854_v62 = vpop.f32.mrf.mxu3 }
 0x317   :  { %v790_v50 = vpop.f32.mrf.mxu1  ;;  %v855_v37 = vadd.f32 %v2251_v36, %v854_v62  ;;  %v870_v62 = vpop.permute.xlu2 %869 }
 0x318   :  { %v1686_v1 = vmul.f32 -1.442695, %v825_v61  ;;  %vm871_vm6 = vcmp.eq.s32.totalorder %v870_v62, 1 }
 0x31a   :  { %v1791_v2 = vpop.eup %1790  ;;  %1792 = vpow2.f32 %v1686_v1 }
 0x31b   :  { %v809_v5 = vadd.f32 1.0, %v1791_v2 }
 0x31d   :  { %1794 = vrcp.f32 %v809_v5  ;;  %v803_v6 = vpop.f32.mrf.mxu2  ;;  %v821_v26 = vand.u32 2147483648, %v809_v5  ;;  %v819_v13 = vand.u32 2147483647, %v809_v5  ;;  %vm815_vm14 = vweird.f32 %v809_v5 }
 0x31e   :  { %v856_v47 = vpop.f32.mrf.mxu3 }
 0x31f   :  { %v822_v30 = vor.u32 1.1754944e-38, %v821_v26  ;;  %vm820_vm0 = vcmp.eq.f32.partialorder %v819_v13, 8.507059e+37  ;;  %v1842_v47 = vld [vmem:[%s2554_s1 + $0x20] sm:$0xff] }
 0x320   :  { %v1793_v57 = vpop.eup %1792 }
 0x321   :  { %v829_v12 = vadd.f32 1.0, %v1793_v57  ;;  %v1218_v57 = vpop.permute.xlu2 %1217 }
 0x322   :  { %vm1219_vm7 = vcmp.eq.s32.totalorder %v1218_v57, %v2181_v38 }
 0x323   :  { %v1795_v16 = vpop.eup %1794  ;;  %1796 = vrcp.f32 %v829_v12  ;;  %v841_v46 = vand.u32 2147483648, %v829_v12  ;;  %vm835_vm2 = vweird.f32 %v829_v12  ;;  %v839_v53 = vand.u32 2147483647, %v829_v12 }
 0x324   :  { %v811_v18 = vmul.f32 %v1795_v16, %v809_v5  ;;  %vm816_vm13 = vweird.f32 %v1795_v16 }
 0x325   :  { %vm817_vm15 = vmor %vm815_vm14, %vm816_vm13  ;;  %v842_v58 = vor.u32 1.1754944e-38, %v841_v46  ;;  %vm840_vm5 = vcmp.eq.f32.partialorder %v839_v53, 8.507059e+37 }
 0x326   :  { %v812_v40 = vsub.f32 1.0, %v811_v18  ;;  %v1845_v18 = vld [vmem:[%s2554_s1 + $0x10] sm:$0xff] }
 0x328   :  { %v813_v11 = vmul.f32 %v1795_v16, %v812_v40  ;;  %v2467_v40 = vpop.permute.xlu1 %1038 }
 0x329   :  { %v1797_v63 = vpop.eup %1796 }
 0x32a   :  { %v831_v10 = vmul.f32 %v1797_v63, %v829_v12  ;;  %v814_v21 = vadd.f32 %v1795_v16, %v813_v11  ;;  %vm836_vm1 = vweird.f32 %v1797_v63  ;;  %v1705_v12 = vsel %vm1219_vm7, 1.0, %v1849_v41 }
 0x32b   :  { %vm837_vm3 = vmor %vm835_vm2, %vm836_vm1 }
 0x32c   :  { %v832_v33 = vsub.f32 1.0, %v831_v10  ;;  %v818_v31 = vsel %vm817_vm15, %v1795_v16, %v814_v21  ;;  %v1844_v16 = vld [vmem:[%s2554_s1 + $0x28] sm:$0xff] }
 0x32d   :  { %v823_v27 = vsel %vm820_vm0, %v822_v30, %v818_v31  ;;  %vm1040_vm0 = vcmp.eq.s32.totalorder %v2467_v40, 1 }
 0x32e   :  { %v858_v43 = vmul.f32 %v855_v37, %v823_v27  ;;  %v833_v3 = vmul.f32 %v1797_v63, %v832_v33 }
 0x330   :  { %v859_v44 = vadd.f32 %v858_v43, %v775_v51  ;;  %v834_v24 = vadd.f32 %v1797_v63, %v833_v3  ;;  %v1387_v26 = vpop.permute.xlu1 %1386 }
 0x331   :  { %vm1388_vm8 = vcmp.eq.s32.totalorder %v1387_v26, %v2181_v38  ;;  %v904_v38 = vpop.f32.mrf.mxu2 }
 0x332   :  { %1798 = vtanh.f32 %v859_v44  ;;  %v838_v54 = vsel %vm837_vm3, %v1797_v63, %v834_v24  ;;  %v1713_v11 = vsel %vm1388_vm8, 1.0, %v1849_v41 }
 0x333   :  { %v843_v50 = vsel %vm840_vm5, %v842_v58, %v838_v54 }
 0x338   :  { %v1799_v55 = vpop.eup %1798 }
 0x339   :  { %v861_v61 = vsub.f32 %v2385_v0, %v1799_v55 }
 0x33b   :  { %v862_v1 = vmul.f32 %v861_v61, %v843_v50 }
 0x33d   :  { %v863_v2 = vadd.f32 %v1799_v55, %v862_v1 }
 0x33f   :  { %v873_v5 = vsel %vm871_vm6, %v863_v2, 0.0  ;;  %v2433_v51 = vsel %vm871_vm6, %v863_v2, %v2385_v0  ;;  %v1843_v0 = vld [vmem:[%s2554_s1 + $0x8] sm:$0xff] }
 0x340   :  { %1687 = vst [vmem:[%s2556_s5 + $0x18] sm:$0xff] %v873_v5  ;;  %v947_v6 = vpack.c.bf16 %v2433_v51, %v2433_v51 }
 0x342   :  { %956 = vmatmul.bf16.vlgmr.msra.gmra.mxu1 %v947_v6  ;;  %969 = vmatmul.bf16.vlgmr.msrb.gmra.mxu2 %v947_v6 }
 0x343   :  { %1022 = vmatmul.bf16.vlgmr.msra.gmra.mxu3 %v947_v6  ;;  %1299 = vmatpush.bf16.msra.mxu1 %v1942_v17 }
 0x344   :  { %1259 = vmatpush.msra.mxu3 %v1842_v47  ;;  %1352 = vmatpush.bf16.msrb.mxu2 %v1974_v28 }
 0x346   :  { %1260 = vmatpush.msra.mxu3 %v1843_v0 }
 0x347   :  { %1300 = vmatpush.bf16.msra.mxu1 %v1960_v23 }
 0x348   :  { %1353 = vmatpush.bf16.msrb.mxu2 %v2010_v39 }
 0x34b   :  { %1301 = vmatpush.bf16.msra.mxu1 %v1998_v35 }
 0x34c   :  { %1354 = vmatpush.bf16.msrb.mxu2 %v2037_v48 }
 0x34f   :  { %1302 = vmatpush.bf16.msra.mxu1 %v2028_v45 }
 0x350   :  { %1355 = vmatpush.bf16.msrb.mxu2 %v2106_v8 }
 0x353   :  { %1706 = vmatmul.msk.f32.vlgmr.msrb.gmra.mxu3 %vm78_vm4, %v1705_v12  ;;  %1303 = vmatpush.bf16.msra.mxu1 %v2050_v52 }
 0x354   :  { %1279 = vmatpush.msrb.mxu3 %v1844_v16  ;;  %1356 = vmatpush.bf16.msrb.mxu2 %v2130_v19 }
 0x356   :  { %1280 = vmatpush.msrb.mxu3 %v1845_v18 }
 0x357   :  { %1304 = vmatpush.bf16.msra.mxu1 %v2070_v59 }
 0x358   :  { %1357 = vmatpush.bf16.msrb.mxu2 %v2148_v25 }
 0x35b   :  { %1707 = vmatmul.msk.f32.vlgmr.msra.gmra.mxu3 %vm78_vm4, %v1705_v12  ;;  %1305 = vmatpush.bf16.msra.mxu1 %v2098_v4 }
 0x35c   :  { %1408 = vmatpush.msra.mxu3 %v2396_v22  ;;  %1358 = vmatpush.bf16.msrb.mxu2 %v2158_v29 }
 0x35e   :  { %1409 = vmatpush.msra.mxu3 %v2403_v14 }
 0x35f   :  { %1306 = vmatpush.bf16.msra.mxu1 %v2121_v15 }
 0x360   :  { %1359 = vmatpush.bf16.msrb.mxu2 %v2168_v34 }
 0x363   :  { %1708 = vmatmul.msk.f32.vlgmr.msrb.gmra.mxu3 %vm78_vm4, %v1705_v12 }
 0x364   :  { %1428 = vmatpush.msrb.mxu3 %v1842_v47 }
 0x366   :  { %1429 = vmatpush.msrb.mxu3 %v1843_v0 }
 0x36b   :  { %1714 = vmatmul.msk.f32.vlgmr.msra.gmra.mxu3 %vm78_vm4, %v1713_v11 }
 0x36c   :  { %1448 = vmatpush.msra.mxu3 %v1844_v16 }
 0x36e   :  { %1449 = vmatpush.msra.mxu3 %v1845_v18 }
 0x373   :  { %1715 = vmatmul.msk.f32.vlgmr.msrb.gmra.mxu3 %vm78_vm4, %v1713_v11 }
 0x374   :  { %1455 = vmatpush.bf16.msrb.mxu3 %v1908_v7 }
 0x378   :  { %1456 = vmatpush.bf16.msrb.mxu3 %v1915_v9  ;;  %v924_v9 = vpop.f32.mrf.mxu0 }
 0x37b   :  { %1716 = vmatmul.msk.f32.vlgmr.msra.gmra.mxu3 %vm78_vm4, %v1713_v11 }
 0x37c   :  { %1457 = vmatpush.bf16.msrb.mxu3 %v1951_v20 }
 0x380   :  { %1458 = vmatpush.bf16.msrb.mxu3 %v1988_v32  ;;  %v944_v50 = vpop.f32.mrf.mxu0 }
 0x384   :  { %1459 = vmatpush.bf16.msrb.mxu3 %v2019_v42 }
 0x388   :  { %1460 = vmatpush.bf16.msrb.mxu3 %v2041_v49 }
 0x38c   :  { %1461 = vmatpush.bf16.msrb.mxu3 %v2061_v56 }
 0x390   :  { %1462 = vmatpush.bf16.msrb.mxu3 %v2074_v60 }
 0x3bf   :  { %v957_v41 = vpop.f32.mrf.mxu1 }
 0x3c0   :  { %v974_v22 = vadd.f32 %v957_v41, %v904_v38 }
 0x3c2   :  { %v1693_v7 = vmul.f32 -1.442695, %v974_v22 }
 0x3c4   :  { %1800 = vpow2.f32 %v1693_v7 }
 0x3c5   :  { %v970_v14 = vpop.f32.mrf.mxu2 }
 0x3c6   :  { %v994_v13 = vadd.f32 %v970_v14, %v924_v9  ;;  %v1023_v63 = vpop.f32.mrf.mxu3 }
 0x3c7   :  { %v959_v20 = vpop.f32.mrf.mxu1  ;;  %v1024_v55 = vadd.f32 %v2251_v36, %v1023_v63 }
 0x3c8   :  { %v1694_v10 = vmul.f32 -1.442695, %v994_v13 }
 0x3ca   :  { %v1801_v32 = vpop.eup %1800  ;;  %1802 = vpow2.f32 %v1694_v10 }
 0x3cb   :  { %v978_v42 = vadd.f32 1.0, %v1801_v32 }
 0x3cd   :  { %1804 = vrcp.f32 %v978_v42  ;;  %v972_v49 = vpop.f32.mrf.mxu2  ;;  %v990_v37 = vand.u32 2147483648, %v978_v42  ;;  %v988_v43 = vand.u32 2147483647, %v978_v42  ;;  %vm984_vm9 = vweird.f32 %v978_v42 }
 0x3ce   :  { %v1025_v21 = vpop.f32.mrf.mxu3  ;;  %v2520_v49 = vld [vmem:[%s2555_s3] ss:$0 sm:$0xff] }
 0x3cf   :  { %v991_v46 = vor.u32 1.1754944e-38, %v990_v37  ;;  %vm989_vm11 = vcmp.eq.f32.partialorder %v988_v43, 8.507059e+37 }
 0x3d0   :  { %v1803_v56 = vpop.eup %1802 }
 0x3d1   :  { %v998_v30 = vadd.f32 1.0, %v1803_v56 }
 0x3d3   :  { %v1805_v60 = vpop.eup %1804  ;;  %1806 = vrcp.f32 %v998_v30  ;;  %v1010_v5 = vand.u32 2147483648, %v998_v30  ;;  %vm1004_vm13 = vweird.f32 %v998_v30  ;;  %v1008_v6 = vand.u32 2147483647, %v998_v30 }
 0x3d4   :  { %v980_v33 = vmul.f32 %v1805_v60, %v978_v42  ;;  %vm985_vm4 = vweird.f32 %v1805_v60 }
 0x3d5   :  { %vm986_vm10 = vmor %vm984_vm9, %vm985_vm4  ;;  %v1011_v57 = vor.u32 1.1754944e-38, %v1010_v5  ;;  %vm1009_vm15 = vcmp.eq.f32.partialorder %v1008_v6, 8.507059e+37 }
 0x3d6   :  { %v981_v31 = vsub.f32 1.0, %v980_v33 }
 0x3d8   :  { %v982_v27 = vmul.f32 %v1805_v60, %v981_v31 }
 0x3d9   :  { %v1807_v3 = vpop.eup %1806 }
 0x3da   :  { %v1000_v44 = vmul.f32 %v1807_v3, %v998_v30  ;;  %v983_v24 = vadd.f32 %v1805_v60, %v982_v27  ;;  %vm1005_vm12 = vweird.f32 %v1807_v3 }
 0x3db   :  { %vm1006_vm14 = vmor %vm1004_vm13, %vm1005_vm12 }
 0x3dc   :  { %v1001_v53 = vsub.f32 1.0, %v1000_v44  ;;  %v987_v54 = vsel %vm986_vm10, %v1805_v60, %v983_v24 }
 0x3dd   :  { %v992_v58 = vsel %vm989_vm11, %v991_v46, %v987_v54 }
 0x3de   :  { %v1027_v61 = vmul.f32 %v1024_v55, %v992_v58  ;;  %v1002_v1 = vmul.f32 %v1807_v3, %v1001_v53  ;;  %v1208_v53 = vpop.permute.xlu0 %1207 }
 0x3df   :  { %vm1209_vm9 = vcmp.eq.s32.totalorder %v1208_v53, 1 }
 0x3e0   :  { %v1028_v62 = vadd.f32 %v1027_v61, %v944_v50  ;;  %v1003_v2 = vadd.f32 %v1807_v3, %v1002_v1  ;;  %v1242_v1 = vpop.f32.mrf.mxu3 }
 0x3e2   :  { %1808 = vtanh.f32 %v1028_v62  ;;  %v1007_v47 = vsel %vm1006_vm14, %v1807_v3, %v1003_v2 }
 0x3e3   :  { %v1012_v16 = vsel %vm1009_vm15, %v1011_v57, %v1007_v47 }
 0x3e8   :  { %v1809_v0 = vpop.eup %1808  ;;  %v1262_v62 = vpop.f32.mrf.mxu3 }
 0x3e9   :  { %v1030_v12 = vsub.f32 %v2433_v51, %v1809_v0 }
 0x3eb   :  { %v1031_v36 = vmul.f32 %v1030_v12, %v1012_v16 }
 0x3ed   :  { %v1032_v18 = vadd.f32 %v1809_v0, %v1031_v36 }
 0x3ef   :  { %v1042_v26 = vsel %vm1040_vm0, %v1032_v18, 0.0  ;;  %v2494_v11 = vsel %vm1040_vm0, %v1032_v18, %v2433_v51 }
 0x3f0   :  { %1695 = vst [vmem:[%s2556_s5 + $0x20] sm:$0xff] %v1042_v26  ;;  %v1116_v38 = vpack.c.bf16 %v2494_v11, %v2494_v11 }
 0x3f2   :  { %1125 = vmatmul.bf16.vlgmr.msrb.gmra.mxu0 %v1116_v38  ;;  %1138 = vmatmul.bf16.vlgmr.msrb.gmra.mxu1 %v1116_v38 }
 0x3f3   :  { %1191 = vmatmul.bf16.vlgmr.msra.gmra.mxu2 %v1116_v38  ;;  %1468 = vmatpush.bf16.msrb.mxu0 %v1942_v17  ;;  %v1073_v17 = vpop.f32.mrf.mxu0 }
 0x3f4   :  { %1521 = vmatpush.bf16.msrb.mxu1 %v1974_v28 }
 0x3f7   :  { %1469 = vmatpush.bf16.msrb.mxu0 %v1960_v23 }
 0x3f8   :  { %1522 = vmatpush.bf16.msrb.mxu1 %v2010_v39 }
 0x3fb   :  { %1470 = vmatpush.bf16.msrb.mxu0 %v1998_v35  ;;  %v1093_v23 = vpop.f32.mrf.mxu0 }
 0x3fc   :  { %1523 = vmatpush.bf16.msrb.mxu1 %v2037_v48 }
 0x3ff   :  { %1471 = vmatpush.bf16.msrb.mxu0 %v2028_v45 }
 0x400   :  { %1524 = vmatpush.bf16.msrb.mxu1 %v2106_v8 }
 0x403   :  { %1472 = vmatpush.bf16.msrb.mxu0 %v2050_v52  ;;  %v1113_v28 = vpop.f32.mrf.mxu0 }
 0x404   :  { %1525 = vmatpush.bf16.msrb.mxu1 %v2130_v19 }
 0x407   :  { %1473 = vmatpush.bf16.msrb.mxu0 %v2070_v59 }
 0x408   :  { %1526 = vmatpush.bf16.msrb.mxu1 %v2148_v25 }
 0x40b   :  { %1474 = vmatpush.bf16.msrb.mxu0 %v2098_v4 }
 0x40c   :  { %1527 = vmatpush.bf16.msrb.mxu1 %v2158_v29 }
 0x40f   :  { %1475 = vmatpush.bf16.msrb.mxu0 %v2121_v15 }
 0x410   :  { %1528 = vmatpush.bf16.msrb.mxu1 %v2168_v34 }
 0x46f   :  { %v1126_v35 = vpop.f32.mrf.mxu0  ;;  %v1139_v39 = vpop.f32.mrf.mxu1 }
 0x470   :  { %v1143_v45 = vadd.f32 %v1126_v35, %v1073_v17  ;;  %v1163_v48 = vadd.f32 %v1139_v39, %v1093_v23 }
 0x472   :  { %v1701_v52 = vmul.f32 -1.442695, %v1143_v45  ;;  %v1702_v8 = vmul.f32 -1.442695, %v1163_v48 }
 0x474   :  { %1810 = vpow2.f32 %v1701_v52 }
 0x475   :  { %1812 = vpow2.f32 %v1702_v8 }
 0x476   :  { %v1192_v59 = vpop.f32.mrf.mxu2 }
 0x477   :  { %v1128_v19 = vpop.f32.mrf.mxu0  ;;  %v1141_v4 = vpop.f32.mrf.mxu1  ;;  %v1193_v21 = vadd.f32 %v2520_v49, %v1192_v59 }
 0x47a   :  { %v1811_v25 = vpop.eup %1810 }
 0x47b   :  { %v1813_v29 = vpop.eup %1812  ;;  %v1147_v51 = vadd.f32 1.0, %v1811_v25 }
 0x47c   :  { %v1167_v15 = vadd.f32 1.0, %v1813_v29 }
 0x47d   :  { %1814 = vrcp.f32 %v1147_v51  ;;  %v1159_v14 = vand.u32 2147483648, %v1147_v51  ;;  %v1157_v63 = vand.u32 2147483647, %v1147_v51  ;;  %vm1153_vm2 = vweird.f32 %v1147_v51 }
 0x47e   :  { %1816 = vrcp.f32 %v1167_v15  ;;  %v1194_v34 = vpop.f32.mrf.mxu2  ;;  %v1179_v37 = vand.u32 2147483648, %v1167_v15  ;;  %vm1173_vm7 = vweird.f32 %v1167_v15  ;;  %v1177_v27 = vand.u32 2147483647, %v1167_v15 }
 0x47f   :  { %v1160_v32 = vor.u32 1.1754944e-38, %v1159_v14  ;;  %vm1158_vm5 = vcmp.eq.f32.partialorder %v1157_v63, 8.507059e+37  ;;  %v1282_v34 = vpop.f32.mrf.mxu3 }
 0x480   :  { %v1180_v44 = vor.u32 1.1754944e-38, %v1179_v37  ;;  %vm1178_vm4 = vcmp.eq.f32.partialorder %v1177_v27, 8.507059e+37 }
 0x483   :  { %v1815_v40 = vpop.eup %1814 }
 0x484   :  { %v1817_v41 = vpop.eup %1816  ;;  %v1149_v22 = vmul.f32 %v1815_v40, %v1147_v51  ;;  %vm1154_vm1 = vweird.f32 %v1815_v40 }
 0x485   :  { %v1169_v9 = vmul.f32 %v1817_v41, %v1167_v15  ;;  %vm1155_vm3 = vmor %vm1153_vm2, %vm1154_vm1  ;;  %vm1174_vm6 = vweird.f32 %v1817_v41 }
 0x486   :  { %v1150_v7 = vsub.f32 1.0, %v1149_v22  ;;  %vm1175_vm8 = vmor %vm1173_vm7, %vm1174_vm6 }
 0x487   :  { %v1170_v10 = vsub.f32 1.0, %v1169_v9 }
 0x488   :  { %v1151_v13 = vmul.f32 %v1815_v40, %v1150_v7 }
 0x489   :  { %v1171_v60 = vmul.f32 %v1817_v41, %v1170_v10 }
 0x48a   :  { %v1152_v20 = vadd.f32 %v1815_v40, %v1151_v13 }
 0x48b   :  { %v1172_v31 = vadd.f32 %v1817_v41, %v1171_v60 }
 0x48c   :  { %v1156_v42 = vsel %vm1155_vm3, %v1815_v40, %v1152_v20 }
 0x48d   :  { %v1161_v56 = vsel %vm1158_vm5, %v1160_v32, %v1156_v42  ;;  %v1176_v43 = vsel %vm1175_vm8, %v1817_v41, %v1172_v31  ;;  %v1377_v32 = vpop.permute.xlu2 %1376 }
 0x48e   :  { %v1196_v30 = vmul.f32 %v1193_v21, %v1161_v56  ;;  %v1181_v46 = vsel %vm1178_vm4, %v1180_v44, %v1176_v43  ;;  %vm1378_vm2 = vcmp.eq.s32.totalorder %v1377_v32, 1 }
 0x490   :  { %v1197_v33 = vadd.f32 %v1196_v30, %v1113_v28 }
 0x492   :  { %1818 = vtanh.f32 %v1197_v33  ;;  %v1411_v33 = vpop.f32.mrf.mxu3 }
 0x498   :  { %v1819_v3 = vpop.eup %1818 }
 0x499   :  { %v1199_v24 = vsub.f32 %v2494_v11, %v1819_v3 }
 0x49a   :  { %v1431_v31 = vpop.f32.mrf.mxu3 }
 0x49b   :  { %v1200_v54 = vmul.f32 %v1199_v24, %v1181_v46 }
 0x49d   :  { %v1201_v55 = vadd.f32 %v1819_v3, %v1200_v54 }
 0x49f   :  { %v1211_v58 = vsel %vm1209_vm9, %v1201_v55, 0.0  ;;  %v2525_v61 = vsel %vm1209_vm9, %v1201_v55, %v2494_v11 }
 0x4a0   :  { %1703 = vst [vmem:[%s2556_s5 + $0x28] sm:$0xff] %v1211_v58  ;;  %v1285_v50 = vpack.c.bf16 %v2525_v61, %v2525_v61 }
 0x4a2   :  { %1294 = vmatmul.bf16.vlgmr.msra.gmra.mxu0 %v1285_v50  ;;  %1307 = vmatmul.bf16.vlgmr.msra.gmra.mxu1 %v1285_v50  ;;  %v1451_v37 = vpop.f32.mrf.mxu3 }
 0x4a3   :  { %1360 = vmatmul.bf16.vlgmr.msrb.gmra.mxu2 %v1285_v50 }
 0x51f   :  { %v1295_v2 = vpop.f32.mrf.mxu0  ;;  %v1308_v5 = vpop.f32.mrf.mxu1 }
 0x520   :  { %v1312_v6 = vadd.f32 %v1295_v2, %v1242_v1  ;;  %v1332_v47 = vadd.f32 %v1308_v5, %v1262_v62 }
 0x522   :  { %v1709_v0 = vmul.f32 -1.442695, %v1312_v6  ;;  %v1710_v57 = vmul.f32 -1.442695, %v1332_v47 }
 0x524   :  { %1820 = vpow2.f32 %v1709_v0 }
 0x525   :  { %1822 = vpow2.f32 %v1710_v57 }
 0x526   :  { %v1361_v12 = vpop.f32.mrf.mxu2 }
 0x527   :  { %v1297_v16 = vpop.f32.mrf.mxu0  ;;  %v1310_v36 = vpop.f32.mrf.mxu1  ;;  %v1362_v29 = vadd.f32 %v2520_v49, %v1361_v12 }
 0x52a   :  { %v1821_v18 = vpop.eup %1820 }
 0x52b   :  { %v1823_v26 = vpop.eup %1822  ;;  %v1316_v11 = vadd.f32 1.0, %v1821_v18 }
 0x52c   :  { %v1336_v38 = vadd.f32 1.0, %v1823_v26 }
 0x52d   :  { %1824 = vrcp.f32 %v1316_v11  ;;  %v1328_v48 = vand.u32 2147483648, %v1316_v11  ;;  %v1326_v8 = vand.u32 2147483647, %v1316_v11  ;;  %vm1322_vm11 = vweird.f32 %v1316_v11 }
 0x52e   :  { %1826 = vrcp.f32 %v1336_v38  ;;  %v1363_v17 = vpop.f32.mrf.mxu2  ;;  %v1348_v7 = vand.u32 2147483648, %v1336_v38  ;;  %vm1342_vm15 = vweird.f32 %v1336_v38  ;;  %v1346_v9 = vand.u32 2147483647, %v1336_v38 }
 0x52f   :  { %v1329_v4 = vor.u32 1.1754944e-38, %v1328_v48  ;;  %vm1327_vm13 = vcmp.eq.f32.partialorder %v1326_v8, 8.507059e+37 }
 0x530   :  { %v1349_v63 = vor.u32 1.1754944e-38, %v1348_v7  ;;  %vm1347_vm1 = vcmp.eq.f32.partialorder %v1346_v9, 8.507059e+37 }
 0x533   :  { %v1825_v23 = vpop.eup %1824 }
 0x534   :  { %v1827_v28 = vpop.eup %1826  ;;  %v1318_v35 = vmul.f32 %v1825_v23, %v1316_v11  ;;  %vm1323_vm10 = vweird.f32 %v1825_v23 }
 0x535   :  { %v1338_v45 = vmul.f32 %v1827_v28, %v1336_v38  ;;  %vm1324_vm12 = vmor %vm1322_vm11, %vm1323_vm10  ;;  %vm1343_vm14 = vweird.f32 %v1827_v28 }
 0x536   :  { %v1319_v39 = vsub.f32 1.0, %v1318_v35  ;;  %vm1344_vm0 = vmor %vm1342_vm15, %vm1343_vm14 }
 0x537   :  { %v1339_v19 = vsub.f32 1.0, %v1338_v45 }
 0x538   :  { %v1320_v52 = vmul.f32 %v1825_v23, %v1319_v39 }
 0x539   :  { %v1340_v40 = vmul.f32 %v1827_v28, %v1339_v19 }
 0x53a   :  { %v1321_v59 = vadd.f32 %v1825_v23, %v1320_v52 }
 0x53b   :  { %v1341_v22 = vadd.f32 %v1827_v28, %v1340_v40 }
 0x53c   :  { %v1325_v25 = vsel %vm1324_vm12, %v1825_v23, %v1321_v59 }
 0x53d   :  { %v1330_v51 = vsel %vm1327_vm13, %v1329_v4, %v1325_v25  ;;  %v1345_v14 = vsel %vm1344_vm0, %v1827_v28, %v1341_v22  ;;  %v1546_v4 = vpop.permute.xlu0 %1545 }
 0x53e   :  { %v1365_v15 = vmul.f32 %v1362_v29, %v1330_v51  ;;  %v1350_v10 = vsel %vm1347_vm1, %v1349_v63, %v1345_v14  ;;  %vm1547_vm11 = vcmp.eq.s32.totalorder %v1546_v4, 1 }
 0x540   :  { %v1366_v41 = vadd.f32 %v1365_v15, %v1282_v34 }
 0x542   :  { %1828 = vtanh.f32 %v1366_v41 }
 0x548   :  { %v1829_v13 = vpop.eup %1828 }
 0x549   :  { %v1368_v20 = vsub.f32 %v2525_v61, %v1829_v13 }
 0x54b   :  { %v1369_v42 = vmul.f32 %v1368_v20, %v1350_v10 }
 0x54d   :  { %v1370_v21 = vadd.f32 %v1829_v13, %v1369_v42 }
 0x54f   :  { %v1380_v56 = vsel %vm1378_vm2, %v1370_v21, 0.0  ;;  %v2535_v30 = vsel %vm1378_vm2, %v1370_v21, %v2525_v61 }
 0x550   :  { %1711 = vst [vmem:[%s2556_s5 + $0x30] sm:$0xff] %v1380_v56  ;;  %v1454_v60 = vpack.c.bf16 %v2535_v30, %v2535_v30 }
 0x552   :  { %1463 = vmatmul.bf16.vlgmr.msrb.gmra.mxu3 %v1454_v60  ;;  %1476 = vmatmul.bf16.vlgmr.msrb.gmra.mxu0 %v1454_v60 }
 0x553   :  { %1529 = vmatmul.bf16.vlgmr.msrb.gmra.mxu1 %v1454_v60 }
 0x5cf   :  { %v1477_v27 = vpop.f32.mrf.mxu0 }
 0x5d0   :  { %v1501_v43 = vadd.f32 %v1477_v27, %v1431_v31  ;;  %v1530_v3 = vpop.f32.mrf.mxu1 }
 0x5d1   :  { %v1531_v11 = vadd.f32 %v2520_v49, %v1530_v3 }
 0x5d2   :  { %v1718_v44 = vmul.f32 -1.442695, %v1501_v43 }
 0x5d4   :  { %1830 = vpow2.f32 %v1718_v44 }
 0x5d5   :  { %v1464_v24 = vpop.f32.mrf.mxu3 }
 0x5d6   :  { %v1481_v46 = vadd.f32 %v1464_v24, %v1411_v33 }
 0x5d7   :  { %v1479_v53 = vpop.f32.mrf.mxu0 }
 0x5d8   :  { %v1717_v54 = vmul.f32 -1.442695, %v1481_v46  ;;  %v1532_v55 = vpop.f32.mrf.mxu1 }
 0x5da   :  { %1832 = vpow2.f32 %v1717_v54  ;;  %v1831_v58 = vpop.eup %1830 }
 0x5db   :  { %v1505_v1 = vadd.f32 1.0, %v1831_v58 }
 0x5dd   :  { %v1466_v61 = vpop.f32.mrf.mxu3  ;;  %v1517_v45 = vand.u32 2147483648, %v1505_v1  ;;  %vm1511_vm4 = vweird.f32 %v1505_v1  ;;  %v1515_v48 = vand.u32 2147483647, %v1505_v1 }
 0x5df   :  { %v1518_v59 = vor.u32 1.1754944e-38, %v1517_v45  ;;  %vm1516_vm10 = vcmp.eq.f32.partialorder %v1515_v48, 8.507059e+37 }
 0x5e0   :  { %v1833_v50 = vpop.eup %1832 }
 0x5e1   :  { %v1485_v62 = vadd.f32 1.0, %v1833_v50 }
 0x5e3   :  { %1834 = vrcp.f32 %v1485_v62  ;;  %v1497_v57 = vand.u32 2147483648, %v1485_v62  ;;  %v1495_v16 = vand.u32 2147483647, %v1485_v62  ;;  %vm1491_vm5 = vweird.f32 %v1485_v62 }
 0x5e4   :  { %1836 = vrcp.f32 %v1505_v1 }
 0x5e5   :  { %v1498_v26 = vor.u32 1.1754944e-38, %v1497_v57  ;;  %vm1496_vm7 = vcmp.eq.f32.partialorder %v1495_v16, 8.507059e+37 }
 0x5e9   :  { %v1835_v2 = vpop.eup %1834 }
 0x5ea   :  { %v1837_v5 = vpop.eup %1836  ;;  %v1487_v6 = vmul.f32 %v1835_v2, %v1485_v62  ;;  %vm1492_vm3 = vweird.f32 %v1835_v2 }
 0x5eb   :  { %v1507_v0 = vmul.f32 %v1837_v5, %v1505_v1  ;;  %vm1493_vm6 = vmor %vm1491_vm5, %vm1492_vm3  ;;  %vm1512_vm8 = vweird.f32 %v1837_v5 }
 0x5ec   :  { %v1488_v47 = vsub.f32 1.0, %v1487_v6  ;;  %vm1513_vm9 = vmor %vm1511_vm4, %vm1512_vm8 }
 0x5ed   :  { %v1508_v18 = vsub.f32 1.0, %v1507_v0 }
 0x5ee   :  { %v1489_v12 = vmul.f32 %v1835_v2, %v1488_v47 }
 0x5ef   :  { %v1509_v28 = vmul.f32 %v1837_v5, %v1508_v18 }
 0x5f0   :  { %v1490_v36 = vadd.f32 %v1835_v2, %v1489_v12 }
 0x5f1   :  { %v1510_v39 = vadd.f32 %v1837_v5, %v1509_v28 }
 0x5f2   :  { %v1494_v38 = vsel %vm1493_vm6, %v1835_v2, %v1490_v36 }
 0x5f3   :  { %v1499_v17 = vsel %vm1496_vm7, %v1498_v26, %v1494_v38  ;;  %v1514_v52 = vsel %vm1513_vm9, %v1837_v5, %v1510_v39 }
 0x5f4   :  { %v1534_v23 = vmul.f32 %v1531_v11, %v1499_v17  ;;  %v1519_v49 = vsel %vm1516_vm10, %v1518_v59, %v1514_v52 }
 0x5f6   :  { %v1535_v35 = vadd.f32 %v1534_v23, %v1451_v37 }
 0x5f8   :  { %1838 = vtanh.f32 %v1535_v35 }
 0x5fe   :  { %v1839_v8 = vpop.eup %1838 }
 0x5ff   :  { %v1537_v19 = vsub.f32 %v2535_v30, %v1839_v8 }
 0x601   :  { %v1538_v25 = vmul.f32 %v1537_v19, %v1519_v49 }
 0x603   :  { %v1539_v29 = vadd.f32 %v1839_v8, %v1538_v25 }
 0x605   :  { %v1548_v51 = vsel %vm1547_vm11, %v1539_v29, %v2535_v30  ;;  %v1549_v15 = vsel %vm1547_vm11, %v1539_v29, 0.0 }
 0x606   :  { %1719 = vst [vmem:[%s2556_s5 + $0x38] sm:$0xff] %v1549_v15 }
 0x607   :  { %1553 = vst [vmem:[%s2557_s6] sm:$0xff] %v1548_v51 }

</bundles_post_ra>
